<compile_context>
chip_gen: v7x
topology: tpu7x:2x2x1
jax: 0.10.0
libtpu: 0.0.40
codegen_flags: <defaults>
</compile_context>

<pallas_src>
import functools

import jax
import jax.numpy as jnp
from jax import lax
from jax.experimental import pallas as pl
from jax.experimental.pallas import tpu as pltpu


# ----------------------------------------------------------------------------
# Helpers
# ----------------------------------------------------------------------------
def _vmem_capacity_bytes():
    try:
        return int(pltpu.get_tpu_info().vmem_capacity_bytes)
    except Exception:
        return 64 * 2 ** 20            # assume the smallest (v7x per-TC) budget


def _pick_tile_h(H, W, Cout):
    # Largest divisor of H such that ~3 live f32 (th*W, Cout) temporaries stay
    # under ~6 MiB, th*W is a multiple of the sublane tile (keeps the
    # (th,W,Cin)->(th*W,Cin) merges free), and there are >= 2 tiles along H
    # when H >= 16 (pipelining / v7x megacore).  Real tuning = per-chip sweep.
    budget = 6 * 2 ** 20
    divisors = [d for d in range(1, H + 1) if H % d == 0]

    def ok(d, cap):
        return (d <= cap and 3 * d * W * Cout * 4 <= budget
                and ((d * W) % 8 == 0 or d == H))

    cap = H // 2 if H >= 16 else H
    good = [d for d in divisors if ok(d, cap)]
    if not good:
        good = [d for d in divisors if ok(d, H)]
    return max(good) if good else H


# ----------------------------------------------------------------------------
# Pass A: conv3x3 + BN1 + ReLU -> y tile (bf16) ; channel sums -> attention
# ----------------------------------------------------------------------------
def _conv_kernel(x_ref, w_ref, s1_ref, b1_ref, w1_ref, s2_ref, b2_ref,
                 y_ref, att_ref, *, th, W, Cin, Cout):
    # x_ref  : (1, H+2, W+2, Cin) bf16  full padded image for batch n
    #          (block index constant along the tile axis -> DMA'd once per n)
    # w_ref  : (3, 3, Cin, Cout)  bf16  3x3 conv weight (HWIO)
    # s1,b1  : (1, Cout) f32            folded BN1 scale / bias
    # w1_ref : (Cout, Cout) bf16        1x1 conv weight (I, O)
    # s2,b2  : (1, Cout) f32            folded BN2 scale (already /(H*W)) / bias
    # y_ref  : (1, th*W, Cout) bf16     ReLU(BN1(conv)) rows for this H-tile
    # att_ref: (1, 1, Cout) f32         channel-sum accumulator across tiles;
    #                                   holds sigmoid attention after last tile
    t = pl.program_id(1)

    # --- 3x3 conv (no bias): 9 per-tap MXU matmuls with K=Cin, f32 accumulate.
    acc = jnp.zeros((th * W, Cout), jnp.float32)
    for kh in range(3):
        for kw in range(3):
            patch = x_ref[0, pl.ds(t * th + kh, th), kw:kw + W, :]   # (th,W,Cin)
            acc = acc + jnp.dot(patch.reshape(th * W, Cin), w_ref[kh, kw],
                                preferred_element_type=jnp.float32)

    # --- BN1 (folded) + ReLU in f32 ---
    y = jnp.maximum(acc * s1_ref[...] + b1_ref[...], 0.0)            # (th*W,Cout)

    # --- GAP: accumulate channel sums across spatial tiles (resident output) --
    @pl.when(t == 0)
    def _():
        att_ref[...] = jnp.zeros_like(att_ref)

    att_ref[0] = att_ref[0] + jnp.sum(y, axis=0, keepdims=True)      # (1, Cout)

    # --- last tile: 1x1 conv + BN2 (GAP mean folded into s2) + sigmoid -------
    @pl.when(t == pl.num_programs(1) - 1)
    def _():
        a = jnp.dot(att_ref[0].astype(jnp.bfloat16), w1_ref[...],
                    preferred_element_type=jnp.float32)               # (1, Cout)
        att_ref[0] = jax.nn.sigmoid(a * s2_ref[...] + b2_ref[...])

    # --- bf16 writeback of the y tile (lane-dense when Cout % 128 == 0) ------
    y_ref[0] = y.astype(y_ref.dtype)


# ----------------------------------------------------------------------------
# Pass B: out = y * att  (channel attention, elementwise)
# ----------------------------------------------------------------------------
def _scale_kernel(y_ref, att_ref, out_ref):
    # y_ref  : (1, th*W, Cout) bf16 ; att_ref : (1, 1, Cout) f32
    att = att_ref[0]                                                 # (1, Cout)
    out_ref[0] = (y_ref[0].astype(jnp.float32) * att).astype(out_ref.dtype)


# ----------------------------------------------------------------------------
# Wrapper: NCHW f32 in (PyTorch convention) -> NHWC bf16 out (no relayout pass)
# ----------------------------------------------------------------------------
@jax.jit
def attention_refinement(x_nchw, w3_hwio, s1, b1, w1_io, s2, b2):
    N, Cin, H, W = x_nchw.shape
    Cout = w3_hwio.shape[3]
    th = _pick_tile_h(H, W, Cout)
    nT = H // th

    # transpose + bf16 cast + SAME pad fuse into one XLA producer pass under jit
    x_pad = jnp.pad(jnp.transpose(x_nchw, (0, 2, 3, 1)).astype(jnp.bfloat16),
                    ((0, 0), (1, 1), (1, 1), (0, 0)))            # (N,H+2,W+2,Cin)

    w9 = w3_hwio.astype(jnp.bfloat16)                            # (3,3,Cin,Cout)
    w1b = w1_io.astype(jnp.bfloat16)                             # (Cout, Cout)
    s2_eff = s2 * (1.0 / (H * W))                                # fold GAP mean

    b16, b32 = 2, 4
    cap = _vmem_capacity_bytes()

    # --------------------------- pass A ------------------------------------
    x_blk = (H + 2) * (W + 2) * Cin * b16
    y_blk = th * W * Cout * b16
    wts = (9 * Cin * Cout + Cout * Cout) * b16 + 4 * Cout * b32
    live_a = 3 * th * W * Cout * b32 + 2 * th * W * Cin * b16
    need_a = 2 * (x_blk + y_blk + Cout * b32 + wts) + live_a + (2 << 20)
    vmem_a = int(min(cap - (4 << 20), max(need_a, 32 << 20)))

    cost_a = pl.CostEstimate(
        flops=N * (2 * H * W * 9 * Cin * Cout + 4 * H * W * Cout
                   + 2 * Cout * Cout + 4 * Cout),
        transcendentals=N * Cout,
        bytes_accessed=(N * x_blk + wts + N * H * W * Cout * b16
                        + N * Cout * b32),
    )

    kern_a = functools.partial(_conv_kernel, th=th, W=W, Cin=Cin, Cout=Cout)
    y_flat, att = pl.pallas_call(
        kern_a,
        out_shape=(jax.ShapeDtypeStruct((N, H * W, Cout), jnp.bfloat16),
                   jax.ShapeDtypeStruct((N, 1, Cout), jnp.float32)),
        grid_spec=pltpu.PrefetchScalarGridSpec(
            num_scalar_prefetch=0,
            grid=(N, nT),
            in_specs=[
                pl.BlockSpec((1, H + 2, W + 2, Cin), lambda n, t: (n, 0, 0, 0)),
                pl.BlockSpec((3, 3, Cin, Cout), lambda n, t: (0, 0, 0, 0)),
                pl.BlockSpec((1, Cout), lambda n, t: (0, 0)),
                pl.BlockSpec((1, Cout), lambda n, t: (0, 0)),
                pl.BlockSpec((Cout, Cout), lambda n, t: (0, 0)),
                pl.BlockSpec((1, Cout), lambda n, t: (0, 0)),
                pl.BlockSpec((1, Cout), lambda n, t: (0, 0)),
            ],
            out_specs=(
                pl.BlockSpec((1, th * W, Cout), lambda n, t: (n, t, 0)),
                pl.BlockSpec((1, 1, Cout), lambda n, t: (n, 0, 0)),
            ),
        ),
        compiler_params=pltpu.CompilerParams(
            dimension_semantics=("parallel", "arbitrary"),
            vmem_limit_bytes=vmem_a),
        cost_estimate=cost_a,
    )(x_pad, w9, s1, b1, w1b, s2_eff, b2)

    # --------------------------- pass B ------------------------------------
    need_b = 2 * (2 * y_blk + Cout * b32) + 2 * th * W * Cout * b32 + (1 << 20)
    vmem_b = int(min(cap - (4 << 20), max(need_b, 32 << 20)))
    cost_b = pl.CostEstimate(
        flops=N * 2 * H * W * Cout,
        transcendentals=0,
        bytes_accessed=2 * N * H * W * Cout * b16 + N * Cout * b32,
    )

    out_flat = pl.pallas_call(
        _scale_kernel,
        out_shape=jax.ShapeDtypeStruct((N, H * W, Cout), jnp.bfloat16),
        grid_spec=pltpu.PrefetchScalarGridSpec(
            num_scalar_prefetch=0,
            grid=(N, nT),
            in_specs=[
                pl.BlockSpec((1, th * W, Cout), lambda n, t: (n, t, 0)),
                pl.BlockSpec((1, 1, Cout), lambda n, t: (n, 0, 0)),
            ],
            out_specs=pl.BlockSpec((1, th * W, Cout), lambda n, t: (n, t, 0)),
        ),
        compiler_params=pltpu.CompilerParams(
            dimension_semantics=("parallel", "parallel"),
            vmem_limit_bytes=vmem_b),
        cost_estimate=cost_b,
    )(y_flat, att)

    # free HBM reshape: (N, H*W, Cout) -> NHWC (N, H, W, Cout), bf16
    return out_flat.reshape(N, H, W, Cout)


# ----------------------------------------------------------------------------
# Deterministic parameter construction (synthetic, BN eval mode, folded)
# ----------------------------------------------------------------------------
def make_params(key, in_channels, out_channels, eps=1e-5):
    ks = jax.random.split(key, 10)
    w3_oihw = jax.random.normal(ks[0], (out_channels, in_channels, 3, 3),
                                jnp.float32) * 0.1
    w1_oi = jax.random.normal(ks[1], (out_channels, out_channels),
                              jnp.float32) * 0.1
    g1 = 1.0 + 0.1 * jax.random.normal(ks[2], (out_channels,), jnp.float32)
    be1 = 0.1 * jax.random.normal(ks[3], (out_channels,), jnp.float32)
    mu1 = 0.1 * jax.random.normal(ks[4], (out_channels,), jnp.float32)
    var1 = jax.random.uniform(ks[5], (out_channels,), jnp.float32, 0.5, 1.5)
    g2 = 1.0 + 0.1 * jax.random.normal(ks[6], (out_channels,), jnp.float32)
    be2 = 0.1 * jax.random.normal(ks[7], (out_channels,), jnp.float32)
    mu2 = 0.1 * jax.random.normal(ks[8], (out_channels,), jnp.float32)
    var2 = jax.random.uniform(ks[9], (out_channels,), jnp.float32, 0.5, 1.5)

    s1 = g1 / jnp.sqrt(var1 + eps)
    b1 = be1 - mu1 * s1
    s2 = g2 / jnp.sqrt(var2 + eps)
    b2 = be2 - mu2 * s2

    w3_hwio = jnp.transpose(w3_oihw, (2, 3, 1, 0))   # (3,3,Cin,Cout)
    w1_io = jnp.transpose(w1_oi, (1, 0))             # (Cin=Cout, Cout)
    raw = (w3_oihw, w1_oi, g1, be1, mu1, var1, g2, be2, mu2, var2)
    fused = (w3_hwio, s1.reshape(1, -1), b1.reshape(1, -1),
             w1_io, s2.reshape(1, -1), b2.reshape(1, -1))
    return raw, fused


# ----------------------------------------------------------------------------
# Pure-JAX reference (mirrors the PyTorch forward, BN eval mode, f32, NCHW)
# ----------------------------------------------------------------------------
def reference(x_nchw, raw, eps=1e-5):
    (w3_oihw, w1_oi, g1, be1, mu1, var1, g2, be2, mu2, var2) = raw
    y = lax.conv_general_dilated(
        x_nchw, w3_oihw, window_strides=(1, 1), padding="SAME",
        dimension_numbers=("NCHW", "OIHW", "NCHW"))
    bn = lambda t, g, b, m, v: (t - m[None, :, None, None]) / jnp.sqrt(
        v[None, :, None, None] + eps) * g[None, :, None, None] + b[None, :, None, None]
    y = jnp.maximum(bn(y, g1, be1, mu1, var1), 0.0)
    pooled = jnp.mean(y, axis=(2, 3), keepdims=True)            # (N,C,1,1)
    att = jnp.einsum("ncij,oc->noij", pooled, w1_oi)
    att = jax.nn.sigmoid(bn(att, g2, be2, mu2, var2))
    return y * att


# ----------------------------------------------------------------------------
if __name__ == "__main__":
    key = jax.random.PRNGKey(0)
    k_x, k_p = jax.random.split(key)

    N, Cin, Cout, H, W = 2, 4, 8, 16, 16
    x = jax.random.normal(k_x, (N, Cin, H, W), jnp.float32)

    raw, fused = make_params(k_p, Cin, Cout)

    out = attention_refinement(x, *fused)          # NHWC bf16
    out = jax.block_until_ready(out)

    ref_nhwc = jnp.transpose(reference(x, raw), (0, 2, 3, 1))
    assert out.shape == (N, H, W, Cout)
    out_f32 = out.astype(jnp.float32)
    # bf16 matmul inputs + bf16 activation storage -> relaxed tolerance
    assert jnp.allclose(out_f32, ref_nhwc, atol=3e-2, rtol=3e-2), \
        f"max abs err = {jnp.max(jnp.abs(out_f32 - ref_nhwc))}"

    print("KERNEL_OK")
</pallas_src>

<mosaic_0001>
module attributes {stable_mosaic.version = 11 : i64} {
  func.func @_scale_kernel(%arg0: i32, %arg1: i32, %arg2: memref<1x128x8xbf16, #tpu.memory_space<vmem>>, %arg3: memref<1x1x8xf32, #tpu.memory_space<vmem>>, %arg4: memref<1x128x8xbf16, #tpu.memory_space<vmem>>) attributes {dimension_semantics = [#tpu.dimension_semantics<parallel>, #tpu.dimension_semantics<parallel>], iteration_bounds = array<i64: 2, 2>, scalar_prefetch = 0 : i64, scratch_operands = 0 : i64, tpu.core_type = #tpu.core_type<tc>, window_params = [{transform_indices = @transform_0, window_bounds = array<i64: 1, 128, 8>}, {transform_indices = @transform_1, window_bounds = array<i64: 1, 1, 8>}, {transform_indices = @transform_2, window_bounds = array<i64: 1, 128, 8>}]} {
    %c0 = arith.constant 0 : index
    %c0_0 = arith.constant 0 : index
    %c0_1 = arith.constant 0 : index
    %0 = vector.load %arg3[%c0, %c0_0, %c0_1] : memref<1x1x8xf32, #tpu.memory_space<vmem>>, vector<1x1x8xf32>
    %1 = vector.shape_cast %0 : vector<1x1x8xf32> to vector<1x8xf32>
    %c0_2 = arith.constant 0 : index
    %c0_3 = arith.constant 0 : index
    %c0_4 = arith.constant 0 : index
    %2 = vector.load %arg2[%c0_2, %c0_3, %c0_4] : memref<1x128x8xbf16, #tpu.memory_space<vmem>>, vector<1x128x8xbf16>
    %3 = vector.shape_cast %2 : vector<1x128x8xbf16> to vector<128x8xbf16>
    %4 = arith.extf %3 : vector<128x8xbf16> to vector<128x8xf32>
    %5 = vector.broadcast %1 : vector<1x8xf32> to vector<128x8xf32>
    %6 = arith.mulf %4, %5 : vector<128x8xf32>
    %7 = arith.truncf %6 : vector<128x8xf32> to vector<128x8xbf16>
    %c0_5 = arith.constant 0 : index
    %c0_6 = arith.constant 0 : index
    %c0_7 = arith.constant 0 : index
    %8 = vector.load %arg4[%c0_5, %c0_6, %c0_7] : memref<1x128x8xbf16, #tpu.memory_space<vmem>>, vector<1x128x8xbf16>
    %9 = vector.shape_cast %8 : vector<1x128x8xbf16> to vector<128x8xbf16>
    %10 = vector.shape_cast %7 : vector<128x8xbf16> to vector<1x128x8xbf16>
    tpu.vector_store %arg4[%c0_5, %c0_6, %c0_7], %10 {strides = array<i32>} : memref<1x128x8xbf16, #tpu.memory_space<vmem>>, vector<1x128x8xbf16>,
    return
  }
  func.func @transform_0(%arg0: i32, %arg1: i32) -> (i32, i32, i32) {
    %c0_i32 = arith.constant 0 : i32
    %c0_i32_0 = arith.constant 0 : i32
    return %arg0, %arg1, %c0_i32 : i32, i32, i32
  }
  func.func @transform_1(%arg0: i32, %arg1: i32) -> (i32, i32, i32) {
    %c0_i32 = arith.constant 0 : i32
    %c0_i32_0 = arith.constant 0 : i32
    %c0_i32_1 = arith.constant 0 : i32
    return %arg0, %c0_i32, %c0_i32_0 : i32, i32, i32
  }
  func.func @transform_2(%arg0: i32, %arg1: i32) -> (i32, i32, i32) {
    %c0_i32 = arith.constant 0 : i32
    %c0_i32_0 = arith.constant 0 : i32
    return %arg0, %arg1, %c0_i32 : i32, i32, i32
  }
}

module attributes {stable_mosaic.version = 11 : i64} {
  func.func @_conv_kernel(%arg0: i32, %arg1: i32, %arg2: memref<1x18x18x4xbf16, #tpu.memory_space<vmem>>, %arg3: memref<3x3x4x8xbf16, #tpu.memory_space<vmem>>, %arg4: memref<1x8xf32, #tpu.memory_space<vmem>>, %arg5: memref<1x8xf32, #tpu.memory_space<vmem>>, %arg6: memref<8x8xbf16, #tpu.memory_space<vmem>>, %arg7: memref<1x8xf32, #tpu.memory_space<vmem>>, %arg8: memref<1x8xf32, #tpu.memory_space<vmem>>, %arg9: memref<1x128x8xbf16, #tpu.memory_space<vmem>>, %arg10: memref<1x1x8xf32, #tpu.memory_space<vmem>>) attributes {dimension_semantics = [#tpu.dimension_semantics<parallel>, #tpu.dimension_semantics<arbitrary>], iteration_bounds = array<i64: 2, 2>, scalar_prefetch = 0 : i64, scratch_operands = 0 : i64, tpu.core_type = #tpu.core_type<tc>, window_params = [{transform_indices = @transform_0, window_bounds = array<i64: 1, 18, 18, 4>}, {pipeline_mode = #tpu.pipeline_mode<synchronous>, transform_indices = @transform_1, window_bounds = array<i64: 3, 3, 4, 8>}, {pipeline_mode = #tpu.pipeline_mode<synchronous>, transform_indices = @transform_2, window_bounds = array<i64: 1, 8>}, {pipeline_mode = #tpu.pipeline_mode<synchronous>, transform_indices = @transform_3, window_bounds = array<i64: 1, 8>}, {pipeline_mode = #tpu.pipeline_mode<synchronous>, transform_indices = @transform_4, window_bounds = array<i64: 8, 8>}, {pipeline_mode = #tpu.pipeline_mode<synchronous>, transform_indices = @transform_5, window_bounds = array<i64: 1, 8>}, {pipeline_mode = #tpu.pipeline_mode<synchronous>, transform_indices = @transform_6, window_bounds = array<i64: 1, 8>}, {transform_indices = @transform_7, window_bounds = array<i64: 1, 128, 8>}, {transform_indices = @transform_8, window_bounds = array<i64: 1, 1, 8>}]} {
    %cst = arith.constant 0.000000e+00 : f32
    %0 = vector.broadcast %cst : f32 to vector<128x8xf32>
    %c8_i32 = arith.constant 8 : i32
    %1 = arith.muli %arg1, %c8_i32 : i32
    %c0_i32 = arith.constant 0 : i32
    %2 = arith.addi %1, %c0_i32 : i32
    %c0 = arith.constant 0 : index
    %3 = arith.index_cast %2 : i32 to index
    %c0_0 = arith.constant 0 : index
    %c0_1 = arith.constant 0 : index
    %4 = vector.load %arg2[%c0, %3, %c0_0, %c0_1] : memref<1x18x18x4xbf16, #tpu.memory_space<vmem>>, vector<1x8x16x4xbf16>
    %5 = vector.shape_cast %4 : vector<1x8x16x4xbf16> to vector<8x16x4xbf16>
    %6 = vector.shape_cast %5 : vector<8x16x4xbf16> to vector<128x4xbf16>
    %c0_2 = arith.constant 0 : index
    %c0_3 = arith.constant 0 : index
    %c0_4 = arith.constant 0 : index
    %c0_5 = arith.constant 0 : index
    %7 = vector.load %arg3[%c0_2, %c0_3, %c0_4, %c0_5] : memref<3x3x4x8xbf16, #tpu.memory_space<vmem>>, vector<1x1x4x8xbf16>
    %8 = vector.shape_cast %7 : vector<1x1x4x8xbf16> to vector<4x8xbf16>
    %cst_6 = arith.constant dense<0.000000e+00> : vector<128x8xf32>
    %9 = tpu.matmul %6, %8, %cst_6 {dimension_numbers = #tpu.dot_dimension_numbers<[1], [0], [0], [1], [0, 0, 1, 1], [], []>} : vector<128x4xbf16>, vector<4x8xbf16>, vector<128x8xf32> -> vector<128x8xf32>
    %10 = arith.addf %0, %9 : vector<128x8xf32>
    %c8_i32_7 = arith.constant 8 : i32
    %11 = arith.muli %arg1, %c8_i32_7 : i32
    %c0_i32_8 = arith.constant 0 : i32
    %12 = arith.addi %11, %c0_i32_8 : i32
    %c0_9 = arith.constant 0 : index
    %13 = arith.index_cast %12 : i32 to index
    %c1 = arith.constant 1 : index
    %c0_10 = arith.constant 0 : index
    %14 = vector.load %arg2[%c0_9, %13, %c1, %c0_10] : memref<1x18x18x4xbf16, #tpu.memory_space<vmem>>, vector<1x8x16x4xbf16>
    %15 = vector.shape_cast %14 : vector<1x8x16x4xbf16> to vector<8x16x4xbf16>
    %16 = vector.shape_cast %15 : vector<8x16x4xbf16> to vector<128x4xbf16>
    %c0_11 = arith.constant 0 : index
    %c1_12 = arith.constant 1 : index
    %c0_13 = arith.constant 0 : index
    %c0_14 = arith.constant 0 : index
    %17 = vector.load %arg3[%c0_11, %c1_12, %c0_13, %c0_14] : memref<3x3x4x8xbf16, #tpu.memory_space<vmem>>, vector<1x1x4x8xbf16>
    %18 = vector.shape_cast %17 : vector<1x1x4x8xbf16> to vector<4x8xbf16>
    %cst_15 = arith.constant dense<0.000000e+00> : vector<128x8xf32>
    %19 = tpu.matmul %16, %18, %cst_15 {dimension_numbers = #tpu.dot_dimension_numbers<[1], [0], [0], [1], [0, 0, 1, 1], [], []>} : vector<128x4xbf16>, vector<4x8xbf16>, vector<128x8xf32> -> vector<128x8xf32>
    %20 = arith.addf %10, %19 : vector<128x8xf32>
    %c8_i32_16 = arith.constant 8 : i32
    %21 = arith.muli %arg1, %c8_i32_16 : i32
    %c0_i32_17 = arith.constant 0 : i32
    %22 = arith.addi %21, %c0_i32_17 : i32
    %c0_18 = arith.constant 0 : index
    %23 = arith.index_cast %22 : i32 to index
    %c2 = arith.constant 2 : index
    %c0_19 = arith.constant 0 : index
    %24 = vector.load %arg2[%c0_18, %23, %c2, %c0_19] : memref<1x18x18x4xbf16, #tpu.memory_space<vmem>>, vector<1x8x16x4xbf16>
    %25 = vector.shape_cast %24 : vector<1x8x16x4xbf16> to vector<8x16x4xbf16>
    %26 = vector.shape_cast %25 : vector<8x16x4xbf16> to vector<128x4xbf16>
    %c0_20 = arith.constant 0 : index
    %c2_21 = arith.constant 2 : index
    %c0_22 = arith.constant 0 : index
    %c0_23 = arith.constant 0 : index
    %27 = vector.load %arg3[%c0_20, %c2_21, %c0_22, %c0_23] : memref<3x3x4x8xbf16, #tpu.memory_space<vmem>>, vector<1x1x4x8xbf16>
    %28 = vector.shape_cast %27 : vector<1x1x4x8xbf16> to vector<4x8xbf16>
    %cst_24 = arith.constant dense<0.000000e+00> : vector<128x8xf32>
    %29 = tpu.matmul %26, %28, %cst_24 {dimension_numbers = #tpu.dot_dimension_numbers<[1], [0], [0], [1], [0, 0, 1, 1], [], []>} : vector<128x4xbf16>, vector<4x8xbf16>, vector<128x8xf32> -> vector<128x8xf32>
    %30 = arith.addf %20, %29 : vector<128x8xf32>
    %c8_i32_25 = arith.constant 8 : i32
    %31 = arith.muli %arg1, %c8_i32_25 : i32
    %c1_i32 = arith.constant 1 : i32
    %32 = arith.addi %31, %c1_i32 : i32
    %c0_26 = arith.constant 0 : index
    %33 = arith.index_cast %32 : i32 to index
    %c0_27 = arith.constant 0 : index
    %c0_28 = arith.constant 0 : index
    %34 = vector.load %arg2[%c0_26, %33, %c0_27, %c0_28] : memref<1x18x18x4xbf16, #tpu.memory_space<vmem>>, vector<1x8x16x4xbf16>
    %35 = vector.shape_cast %34 : vector<1x8x16x4xbf16> to vector<8x16x4xbf16>
    %36 = vector.shape_cast %35 : vector<8x16x4xbf16> to vector<128x4xbf16>
    %c1_29 = arith.constant 1 : index
    %c0_30 = arith.constant 0 : index
    %c0_31 = arith.constant 0 : index
    %c0_32 = arith.constant 0 : index
    %37 = vector.load %arg3[%c1_29, %c0_30, %c0_31, %c0_32] : memref<3x3x4x8xbf16, #tpu.memory_space<vmem>>, vector<1x1x4x8xbf16>
    %38 = vector.shape_cast %37 : vector<1x1x4x8xbf16> to vector<4x8xbf16>
    %cst_33 = arith.constant dense<0.000000e+00> : vector<128x8xf32>
    %39 = tpu.matmul %36, %38, %cst_33 {dimension_numbers = #tpu.dot_dimension_numbers<[1], [0], [0], [1], [0, 0, 1, 1], [], []>} : vector<128x4xbf16>, vector<4x8xbf16>, vector<128x8xf32> -> vector<128x8xf32>
    %40 = arith.addf %30, %39 : vector<128x8xf32>
    %c8_i32_34 = arith.constant 8 : i32
    %41 = arith.muli %arg1, %c8_i32_34 : i32
    %c1_i32_35 = arith.constant 1 : i32
    %42 = arith.addi %41, %c1_i32_35 : i32
    %c0_36 = arith.constant 0 : index
    %43 = arith.index_cast %42 : i32 to index
    %c1_37 = arith.constant 1 : index
    %c0_38 = arith.constant 0 : index
    %44 = vector.load %arg2[%c0_36, %43, %c1_37, %c0_38] : memref<1x18x18x4xbf16, #tpu.memory_space<vmem>>, vector<1x8x16x4xbf16>
    %45 = vector.shape_cast %44 : vector<1x8x16x4xbf16> to vector<8x16x4xbf16>
    %46 = vector.shape_cast %45 : vector<8x16x4xbf16> to vector<128x4xbf16>
    %c1_39 = arith.constant 1 : index
    %c1_40 = arith.constant 1 : index
    %c0_41 = arith.constant 0 : index
    %c0_42 = arith.constant 0 : index
    %47 = vector.load %arg3[%c1_39, %c1_40, %c0_41, %c0_42] : memref<3x3x4x8xbf16, #tpu.memory_space<vmem>>, vector<1x1x4x8xbf16>
    %48 = vector.shape_cast %47 : vector<1x1x4x8xbf16> to vector<4x8xbf16>
    %cst_43 = arith.constant dense<0.000000e+00> : vector<128x8xf32>
    %49 = tpu.matmul %46, %48, %cst_43 {dimension_numbers = #tpu.dot_dimension_numbers<[1], [0], [0], [1], [0, 0, 1, 1], [], []>} : vector<128x4xbf16>, vector<4x8xbf16>, vector<128x8xf32> -> vector<128x8xf32>
    %50 = arith.addf %40, %49 : vector<128x8xf32>
    %c8_i32_44 = arith.constant 8 : i32
    %51 = arith.muli %arg1, %c8_i32_44 : i32
    %c1_i32_45 = arith.constant 1 : i32
    %52 = arith.addi %51, %c1_i32_45 : i32
    %c0_46 = arith.constant 0 : index
    %53 = arith.index_cast %52 : i32 to index
    %c2_47 = arith.constant 2 : index
    %c0_48 = arith.constant 0 : index
    %54 = vector.load %arg2[%c0_46, %53, %c2_47, %c0_48] : memref<1x18x18x4xbf16, #tpu.memory_space<vmem>>, vector<1x8x16x4xbf16>
    %55 = vector.shape_cast %54 : vector<1x8x16x4xbf16> to vector<8x16x4xbf16>
    %56 = vector.shape_cast %55 : vector<8x16x4xbf16> to vector<128x4xbf16>
    %c1_49 = arith.constant 1 : index
    %c2_50 = arith.constant 2 : index
    %c0_51 = arith.constant 0 : index
    %c0_52 = arith.constant 0 : index
    %57 = vector.load %arg3[%c1_49, %c2_50, %c0_51, %c0_52] : memref<3x3x4x8xbf16, #tpu.memory_space<vmem>>, vector<1x1x4x8xbf16>
    %58 = vector.shape_cast %57 : vector<1x1x4x8xbf16> to vector<4x8xbf16>
    %cst_53 = arith.constant dense<0.000000e+00> : vector<128x8xf32>
    %59 = tpu.matmul %56, %58, %cst_53 {dimension_numbers = #tpu.dot_dimension_numbers<[1], [0], [0], [1], [0, 0, 1, 1], [], []>} : vector<128x4xbf16>, vector<4x8xbf16>, vector<128x8xf32> -> vector<128x8xf32>
    %60 = arith.addf %50, %59 : vector<128x8xf32>
    %c8_i32_54 = arith.constant 8 : i32
    %61 = arith.muli %arg1, %c8_i32_54 : i32
    %c2_i32 = arith.constant 2 : i32
    %62 = arith.addi %61, %c2_i32 : i32
    %c0_55 = arith.constant 0 : index
    %63 = arith.index_cast %62 : i32 to index
    %c0_56 = arith.constant 0 : index
    %c0_57 = arith.constant 0 : index
    %64 = vector.load %arg2[%c0_55, %63, %c0_56, %c0_57] : memref<1x18x18x4xbf16, #tpu.memory_space<vmem>>, vector<1x8x16x4xbf16>
    %65 = vector.shape_cast %64 : vector<1x8x16x4xbf16> to vector<8x16x4xbf16>
    %66 = vector.shape_cast %65 : vector<8x16x4xbf16> to vector<128x4xbf16>
    %c2_58 = arith.constant 2 : index
    %c0_59 = arith.constant 0 : index
    %c0_60 = arith.constant 0 : index
    %c0_61 = arith.constant 0 : index
    %67 = vector.load %arg3[%c2_58, %c0_59, %c0_60, %c0_61] : memref<3x3x4x8xbf16, #tpu.memory_space<vmem>>, vector<1x1x4x8xbf16>
    %68 = vector.shape_cast %67 : vector<1x1x4x8xbf16> to vector<4x8xbf16>
    %cst_62 = arith.constant dense<0.000000e+00> : vector<128x8xf32>
    %69 = tpu.matmul %66, %68, %cst_62 {dimension_numbers = #tpu.dot_dimension_numbers<[1], [0], [0], [1], [0, 0, 1, 1], [], []>} : vector<128x4xbf16>, vector<4x8xbf16>, vector<128x8xf32> -> vector<128x8xf32>
    %70 = arith.addf %60, %69 : vector<128x8xf32>
    %c8_i32_63 = arith.constant 8 : i32
    %71 = arith.muli %arg1, %c8_i32_63 : i32
    %c2_i32_64 = arith.constant 2 : i32
    %72 = arith.addi %71, %c2_i32_64 : i32
    %c0_65 = arith.constant 0 : index
    %73 = arith.index_cast %72 : i32 to index
    %c1_66 = arith.constant 1 : index
    %c0_67 = arith.constant 0 : index
    %74 = vector.load %arg2[%c0_65, %73, %c1_66, %c0_67] : memref<1x18x18x4xbf16, #tpu.memory_space<vmem>>, vector<1x8x16x4xbf16>
    %75 = vector.shape_cast %74 : vector<1x8x16x4xbf16> to vector<8x16x4xbf16>
    %76 = vector.shape_cast %75 : vector<8x16x4xbf16> to vector<128x4xbf16>
    %c2_68 = arith.constant 2 : index
    %c1_69 = arith.constant 1 : index
    %c0_70 = arith.constant 0 : index
    %c0_71 = arith.constant 0 : index
    %77 = vector.load %arg3[%c2_68, %c1_69, %c0_70, %c0_71] : memref<3x3x4x8xbf16, #tpu.memory_space<vmem>>, vector<1x1x4x8xbf16>
    %78 = vector.shape_cast %77 : vector<1x1x4x8xbf16> to vector<4x8xbf16>
    %cst_72 = arith.constant dense<0.000000e+00> : vector<128x8xf32>
    %79 = tpu.matmul %76, %78, %cst_72 {dimension_numbers = #tpu.dot_dimension_numbers<[1], [0], [0], [1], [0, 0, 1, 1], [], []>} : vector<128x4xbf16>, vector<4x8xbf16>, vector<128x8xf32> -> vector<128x8xf32>
    %80 = arith.addf %70, %79 : vector<128x8xf32>
    %c8_i32_73 = arith.constant 8 : i32
    %81 = arith.muli %arg1, %c8_i32_73 : i32
    %c2_i32_74 = arith.constant 2 : i32
    %82 = arith.addi %81, %c2_i32_74 : i32
    %c0_75 = arith.constant 0 : index
    %83 = arith.index_cast %82 : i32 to index
    %c2_76 = arith.constant 2 : index
    %c0_77 = arith.constant 0 : index
    %84 = vector.load %arg2[%c0_75, %83, %c2_76, %c0_77] : memref<1x18x18x4xbf16, #tpu.memory_space<vmem>>, vector<1x8x16x4xbf16>
    %85 = vector.shape_cast %84 : vector<1x8x16x4xbf16> to vector<8x16x4xbf16>
    %86 = vector.shape_cast %85 : vector<8x16x4xbf16> to vector<128x4xbf16>
    %c2_78 = arith.constant 2 : index
    %c2_79 = arith.constant 2 : index
    %c0_80 = arith.constant 0 : index
    %c0_81 = arith.constant 0 : index
    %87 = vector.load %arg3[%c2_78, %c2_79, %c0_80, %c0_81] : memref<3x3x4x8xbf16, #tpu.memory_space<vmem>>, vector<1x1x4x8xbf16>
    %88 = vector.shape_cast %87 : vector<1x1x4x8xbf16> to vector<4x8xbf16>
    %cst_82 = arith.constant dense<0.000000e+00> : vector<128x8xf32>
    %89 = tpu.matmul %86, %88, %cst_82 {dimension_numbers = #tpu.dot_dimension_numbers<[1], [0], [0], [1], [0, 0, 1, 1], [], []>} : vector<128x4xbf16>, vector<4x8xbf16>, vector<128x8xf32> -> vector<128x8xf32>
    %90 = arith.addf %80, %89 : vector<128x8xf32>
    %c0_83 = arith.constant 0 : index
    %c0_84 = arith.constant 0 : index
    %91 = vector.load %arg4[%c0_83, %c0_84] : memref<1x8xf32, #tpu.memory_space<vmem>>, vector<1x8xf32>
    %92 = vector.broadcast %91 : vector<1x8xf32> to vector<128x8xf32>
    %93 = arith.mulf %90, %92 : vector<128x8xf32>
    %c0_85 = arith.constant 0 : index
    %c0_86 = arith.constant 0 : index
    %94 = vector.load %arg5[%c0_85, %c0_86] : memref<1x8xf32, #tpu.memory_space<vmem>>, vector<1x8xf32>
    %95 = vector.broadcast %94 : vector<1x8xf32> to vector<128x8xf32>
    %96 = arith.addf %93, %95 : vector<128x8xf32>
    %cst_87 = arith.constant 0.000000e+00 : f32
    %97 = vector.broadcast %cst_87 : f32 to vector<128x8xf32>
    %98 = arith.maximumf %96, %97 : vector<128x8xf32>
    %c0_i32_88 = arith.constant 0 : i32
    %99 = arith.cmpi eq, %arg1, %c0_i32_88 : i32
    %100 = arith.extui %99 : i1 to i32
    %c0_i32_89 = arith.constant 0 : i32
    %101 = arith.cmpi ne, %100, %c0_i32_89 : i32
    scf.if %101 {
      %cst_102 = arith.constant 0.000000e+00 : f32
      %117 = vector.broadcast %cst_102 : f32 to vector<1x1x8xf32>
      %c0_103 = arith.constant 0 : index
      %c0_104 = arith.constant 0 : index
      %c0_105 = arith.constant 0 : index
      %118 = vector.load %arg10[%c0_103, %c0_104, %c0_105] : memref<1x1x8xf32, #tpu.memory_space<vmem>>, vector<1x1x8xf32>
      tpu.vector_store %arg10[%c0_103, %c0_104, %c0_105], %117 {strides = array<i32>} : memref<1x1x8xf32, #tpu.memory_space<vmem>>, vector<1x1x8xf32>,
    } else {
    }
    %c0_90 = arith.constant 0 : index
    %c0_91 = arith.constant 0 : index
    %c0_92 = arith.constant 0 : index
    %102 = vector.load %arg10[%c0_90, %c0_91, %c0_92] : memref<1x1x8xf32, #tpu.memory_space<vmem>>, vector<1x1x8xf32>
    %103 = vector.shape_cast %102 : vector<1x1x8xf32> to vector<1x8xf32>
    %cst_93 = arith.constant dense<0.000000e+00> : vector<8xf32>
    %104 = vector.multi_reduction <add>, %98, %cst_93 [0] : vector<128x8xf32> to vector<8xf32>
    %105 = vector.shape_cast %104 : vector<8xf32> to vector<1x8xf32>
    %106 = arith.addf %103, %105 : vector<1x8xf32>
    %c0_94 = arith.constant 0 : index
    %c0_95 = arith.constant 0 : index
    %c0_96 = arith.constant 0 : index
    %107 = vector.load %arg10[%c0_94, %c0_95, %c0_96] : memref<1x1x8xf32, #tpu.memory_space<vmem>>, vector<1x1x8xf32>
    %108 = vector.shape_cast %107 : vector<1x1x8xf32> to vector<1x8xf32>
    %109 = vector.shape_cast %106 : vector<1x8xf32> to vector<1x1x8xf32>
    tpu.vector_store %arg10[%c0_94, %c0_95, %c0_96], %109 {strides = array<i32>} : memref<1x1x8xf32, #tpu.memory_space<vmem>>, vector<1x1x8xf32>,
    %c1_i32_97 = arith.constant 1 : i32
    %110 = arith.cmpi eq, %arg1, %c1_i32_97 : i32
    %111 = arith.extui %110 : i1 to i32
    %c0_i32_98 = arith.constant 0 : i32
    %112 = arith.cmpi ne, %111, %c0_i32_98 : i32
    scf.if %112 {
      %c0_102 = arith.constant 0 : index
      %c0_103 = arith.constant 0 : index
      %c0_104 = arith.constant 0 : index
      %117 = vector.load %arg10[%c0_102, %c0_103, %c0_104] : memref<1x1x8xf32, #tpu.memory_space<vmem>>, vector<1x1x8xf32>
      %118 = vector.shape_cast %117 : vector<1x1x8xf32> to vector<1x8xf32>
      %119 = arith.truncf %118 : vector<1x8xf32> to vector<1x8xbf16>
      %c0_105 = arith.constant 0 : index
      %c0_106 = arith.constant 0 : index
      %120 = vector.load %arg6[%c0_105, %c0_106] : memref<8x8xbf16, #tpu.memory_space<vmem>>, vector<8x8xbf16>
      %cst_107 = arith.constant dense<0.000000e+00> : vector<1x8xf32>
      %121 = tpu.matmul %119, %120, %cst_107 {dimension_numbers = #tpu.dot_dimension_numbers<[1], [0], [0], [1], [0, 0, 1, 1], [], []>} : vector<1x8xbf16>, vector<8x8xbf16>, vector<1x8xf32> -> vector<1x8xf32>
      %c0_108 = arith.constant 0 : index
      %c0_109 = arith.constant 0 : index
      %122 = vector.load %arg7[%c0_108, %c0_109] : memref<1x8xf32, #tpu.memory_space<vmem>>, vector<1x8xf32>
      %123 = arith.mulf %121, %122 : vector<1x8xf32>
      %c0_110 = arith.constant 0 : index
      %c0_111 = arith.constant 0 : index
      %124 = vector.load %arg8[%c0_110, %c0_111] : memref<1x8xf32, #tpu.memory_space<vmem>>, vector<1x8xf32>
      %125 = arith.addf %123, %124 : vector<1x8xf32>
      %126 = arith.negf %125 : vector<1x8xf32>
      %127 = math.exp %126 : vector<1x8xf32>
      %cst_112 = arith.constant 1.000000e+00 : f32
      %128 = vector.broadcast %cst_112 : f32 to vector<1x8xf32>
      %129 = arith.addf %128, %127 : vector<1x8xf32>
      %130 = arith.divf %128, %129 : vector<1x8xf32>
      %c0_113 = arith.constant 0 : index
      %c0_114 = arith.constant 0 : index
      %c0_115 = arith.constant 0 : index
      %131 = vector.load %arg10[%c0_113, %c0_114, %c0_115] : memref<1x1x8xf32, #tpu.memory_space<vmem>>, vector<1x1x8xf32>
      %132 = vector.shape_cast %131 : vector<1x1x8xf32> to vector<1x8xf32>
      %133 = vector.shape_cast %130 : vector<1x8xf32> to vector<1x1x8xf32>
      tpu.vector_store %arg10[%c0_113, %c0_114, %c0_115], %133 {strides = array<i32>} : memref<1x1x8xf32, #tpu.memory_space<vmem>>, vector<1x1x8xf32>,
    } else {
    }
    %113 = arith.truncf %98 : vector<128x8xf32> to vector<128x8xbf16>
    %c0_99 = arith.constant 0 : index
    %c0_100 = arith.constant 0 : index
    %c0_101 = arith.constant 0 : index
    %114 = vector.load %arg9[%c0_99, %c0_100, %c0_101] : memref<1x128x8xbf16, #tpu.memory_space<vmem>>, vector<1x128x8xbf16>
    %115 = vector.shape_cast %114 : vector<1x128x8xbf16> to vector<128x8xbf16>
    %116 = vector.shape_cast %113 : vector<128x8xbf16> to vector<1x128x8xbf16>
    tpu.vector_store %arg9[%c0_99, %c0_100, %c0_101], %116 {strides = array<i32>} : memref<1x128x8xbf16, #tpu.memory_space<vmem>>, vector<1x128x8xbf16>,
    return
  }
  func.func @transform_0(%arg0: i32, %arg1: i32) -> (i32, i32, i32, i32) {
    %c0_i32 = arith.constant 0 : i32
    %c0_i32_0 = arith.constant 0 : i32
    %c0_i32_1 = arith.constant 0 : i32
    %c0_i32_2 = arith.constant 0 : i32
    return %arg0, %c0_i32, %c0_i32_0, %c0_i32_1 : i32, i32, i32, i32
  }
  func.func @transform_1(%arg0: i32, %arg1: i32) -> (i32, i32, i32, i32) {
    %c0_i32 = arith.constant 0 : i32
    %c0_i32_0 = arith.constant 0 : i32
    %c0_i32_1 = arith.constant 0 : i32
    %c0_i32_2 = arith.constant 0 : i32
    %c0_i32_3 = arith.constant 0 : i32
    return %c0_i32, %c0_i32_0, %c0_i32_1, %c0_i32_2 : i32, i32, i32, i32
  }
  func.func @transform_2(%arg0: i32, %arg1: i32) -> (i32, i32) {
    %c0_i32 = arith.constant 0 : i32
    %c0_i32_0 = arith.constant 0 : i32
    %c0_i32_1 = arith.constant 0 : i32
    return %c0_i32, %c0_i32_0 : i32, i32
  }
  func.func @transform_3(%arg0: i32, %arg1: i32) -> (i32, i32) {
    %c0_i32 = arith.constant 0 : i32
    %c0_i32_0 = arith.constant 0 : i32
    %c0_i32_1 = arith.constant 0 : i32
    return %c0_i32, %c0_i32_0 : i32, i32
  }
  func.func @transform_4(%arg0: i32, %arg1: i32) -> (i32, i32) {
    %c0_i32 = arith.constant 0 : i32
    %c0_i32_0 = arith.constant 0 : i32
    %c0_i32_1 = arith.constant 0 : i32
    return %c0_i32, %c0_i32_0 : i32, i32
  }
  func.func @transform_5(%arg0: i32, %arg1: i32) -> (i32, i32) {
    %c0_i32 = arith.constant 0 : i32
    %c0_i32_0 = arith.constant 0 : i32
    %c0_i32_1 = arith.constant 0 : i32
    return %c0_i32, %c0_i32_0 : i32, i32
  }
  func.func @transform_6(%arg0: i32, %arg1: i32) -> (i32, i32) {
    %c0_i32 = arith.constant 0 : i32
    %c0_i32_0 = arith.constant 0 : i32
    %c0_i32_1 = arith.constant 0 : i32
    return %c0_i32, %c0_i32_0 : i32, i32
  }
  func.func @transform_7(%arg0: i32, %arg1: i32) -> (i32, i32, i32) {
    %c0_i32 = arith.constant 0 : i32
    %c0_i32_0 = arith.constant 0 : i32
    return %arg0, %arg1, %c0_i32 : i32, i32, i32
  }
  func.func @transform_8(%arg0: i32, %arg1: i32) -> (i32, i32, i32) {
    %c0_i32 = arith.constant 0 : i32
    %c0_i32_0 = arith.constant 0 : i32
    %c0_i32_1 = arith.constant 0 : i32
    return %arg0, %c0_i32, %c0_i32_0 : i32, i32, i32
  }
}

</mosaic_0001>

<bundles_post_ra>
// kernel: attention_refinement.3
= control target key start
LH: loop header
LB: loop body
LE: loop exit
PB: predicated region body
PF: predicated region fallthrough
CT: control target
= control target key end

     0   :  { %s612_s9 = smov 0   ;;  %s614_s10 = smov 0   ;;  %s710_s0 = inlined_call_operand.vmem [shape: bf16[2,256,8], index: 0, kind: input, shape index: {}]   ;;  %s711_s1 = inlined_call_operand.vmem [shape: f32[2,1,8], index: 1, kind: input, shape index: {}]   ;;  %s712_s2 = inlined_call_operand.vmem [shape: bf16[2,256,8], index: 2, kind: output, shape index: {}]  }
   0x1   :  { %s616_s11 = smov 0   ;;  %s618_s12 = smov 0  }
   0x2   :  { %s620_s13 = smov 0  }
   0x3 LB: > { %s21_s14 = sadd.s32 1, %s587_s11  ;;  %s24_s15 = sadd.s32 1, %s591_s12  ;;  %s595_s13 = sphi %s620_s13, %s12_s13   ;;  %s591_s12 = sphi %s618_s12, %s716_s12   ;;  %s587_s11 = sphi %s616_s11, %s715_s11   ;;  %s583_s10 = sphi %s614_s10, %s714_s10   ;;  %s579_s9 = sphi %s612_s9, %s713_s9  }
   0x4   : > { %p22_p0 = scmp.ge.s32.totalorder %s21_s14, 2  ;;  %p436_p1 = scmp.ge.s32.totalorder %s595_s13, 1 }
   0x5   : > { %p141_p2 = scmp.lt.s32.totalorder %s595_s13, 5 }
   0x6   : > { %s718_s14 = smov (%p22_p0, %s21_s14), 0  ;;  %s720_s15 = smov (!%p22_p0, %s24_s15), %s591_s12 }
   0x7   : > { %p142_p3 = pnand %p436_p1, %p141_p2  ;;  %p26_p4 = scmp.ge.s32.totalorder %s720_s15, 2 }
   0x8   : > { %s437_s16 = sshll.u32 (!%p142_p3), %s579_s9, 4  ;;  %p175_p5 = scmp.lt.s32.totalorder (!%p142_p3), %s583_s10, 1  ;;  %vm316_vm0 = vcmask (!%p142_p3), 60416  }
   0x9   : > { %s722_s15 = smov (%p26_p4, %s720_s15), 0  ;;  %145 = sbr.rel (%p142_p3) target bundleno = 38 (0x26), region = 28 }
   0xa   : > { %p177_p6 = scmp.lt.s32.totalorder (!%p142_p3), %s437_s16, 31 }
  0x10   : > { %s724_s10 = smov (!%p175_p5, %s583_s10), 1  ;;  %s726_s16 = smov (!%p177_p6, %s437_s16), 31 }
  0x11   : > { %s438_s17 = sshll.u32 %s724_s10, 5  ;;  %s186_s20 = scalar_lea.vmem %s711_s1, %s724_s10 }
  0x12   : > { %s180_s21 = sadd.s32 %s438_s17, %s726_s16  ;;  %v443_v0 = vld [vmem:[%s186_s20] ss:$0 sm:$0xff] }
  0x13   : > { %s439_s22 = sshll.u32 %s180_s21, 2 }
  0x14   : > { %s648_s25 = scalar_lea.vmem %s710_s0, %s439_s22  ;;  %s657_s28 = scalar_lea.vmem %s712_s2, %s439_s22 }
  0x15   : > { %v479_v1 = vld [vmem:[%s648_s25] sm:$0xff]   ;;  %v510_v2 = vld [vmem:[%s648_s25 + $0x8] sm:$0xff]   ;;  %v511_v3 = vld [vmem:[%s648_s25 + $0x10] sm:$0xff]  }
  0x16   : > { %v480_v4 = vunpack.c.l.bf16 %v479_v1  ;;  %v481_v5 = vunpack.c.h.bf16 %v479_v1  ;;  %v484_v6 = vunpack.c.l.bf16 %v510_v2  ;;  %v485_v7 = vunpack.c.h.bf16 %v510_v2  ;;  %v512_v8 = vld [vmem:[%s648_s25 + $0x18] sm:$0xff]   ;;  %v513_v21 = vld [vmem:[%s648_s25 + $0x20] sm:$0xff]   ;;  %v514_v22 = vld [vmem:[%s648_s25 + $0x28] sm:$0xff]  }
  0x17   : > { %v488_v9 = vunpack.c.l.bf16 %v511_v3  ;;  %v489_v10 = vunpack.c.h.bf16 %v511_v3  ;;  %v492_v11 = vunpack.c.l.bf16 %v512_v8  ;;  %v493_v12 = vunpack.c.h.bf16 %v512_v8  ;;  %v515_v27 = vld [vmem:[%s648_s25 + $0x30] sm:$0xff]   ;;  %v516_v28 = vld [vmem:[%s648_s25 + $0x38] sm:$0xff]  }
  0x18   : > { %v236_v13 = vmul.f32 %v480_v4, %v443_v0  ;;  %v237_v14 = vmul.f32 %v481_v5, %v443_v0  ;;  %v238_v15 = vmul.f32 %v484_v6, %v443_v0  ;;  %v239_v16 = vmul.f32 %v485_v7, %v443_v0 }
  0x19   : > { %v240_v17 = vmul.f32 %v488_v9, %v443_v0  ;;  %v241_v18 = vmul.f32 %v489_v10, %v443_v0  ;;  %v242_v19 = vmul.f32 %v492_v11, %v443_v0  ;;  %v243_v20 = vmul.f32 %v493_v12, %v443_v0 }
  0x1a   : > { %v462_v23 = vpack.c.bf16 %v236_v13, %v236_v13  ;;  %v463_v24 = vpack.c.bf16 %v237_v14, %v237_v14  ;;  %v464_v25 = vpack.c.bf16 %v238_v15, %v238_v15  ;;  %v465_v26 = vpack.c.bf16 %v239_v16, %v239_v16 }
  0x1b   : > { %v466_v29 = vpack.c.bf16 %v240_v17, %v240_v17  ;;  %v467_v30 = vpack.c.bf16 %v241_v18, %v241_v18  ;;  %v468_v31 = vpack.c.bf16 %v242_v19, %v242_v19  ;;  %v469_v32 = vpack.c.bf16 %v243_v20, %v243_v20 }
  0x1c   : > { %317 = vst.msk [vmem:[%s657_s28] sm:$0xf] %vm316_vm0, %v462_v23  ;;  %318 = vst.msk [vmem:[%s657_s28 + $0x4] sm:$0xf] %vm316_vm0, %v463_v24  ;;  %v496_v33 = vunpack.c.l.bf16 %v513_v21  ;;  %v497_v34 = vunpack.c.h.bf16 %v513_v21  ;;  %v500_v35 = vunpack.c.l.bf16 %v514_v22  ;;  %v501_v36 = vunpack.c.h.bf16 %v514_v22 }
  0x1d   : > { %319 = vst.msk [vmem:[%s657_s28 + $0x8] sm:$0xf] %vm316_vm0, %v464_v25  ;;  %320 = vst.msk [vmem:[%s657_s28 + $0xc] sm:$0xf] %vm316_vm0, %v465_v26  ;;  %v504_v37 = vunpack.c.l.bf16 %v515_v27  ;;  %v505_v38 = vunpack.c.h.bf16 %v515_v27  ;;  %v508_v39 = vunpack.c.l.bf16 %v516_v28  ;;  %v509_v40 = vunpack.c.h.bf16 %v516_v28 }
  0x1e   : > { %321 = vst.msk [vmem:[%s657_s28 + $0x10] sm:$0xf] %vm316_vm0, %v466_v29  ;;  %322 = vst.msk [vmem:[%s657_s28 + $0x14] sm:$0xf] %vm316_vm0, %v467_v30  ;;  %v244_v41 = vmul.f32 %v496_v33, %v443_v0  ;;  %v245_v42 = vmul.f32 %v497_v34, %v443_v0  ;;  %v246_v43 = vmul.f32 %v500_v35, %v443_v0 }
  0x1f   : > { %323 = vst.msk [vmem:[%s657_s28 + $0x18] sm:$0xf] %vm316_vm0, %v468_v31  ;;  %324 = vst.msk [vmem:[%s657_s28 + $0x1c] sm:$0xf] %vm316_vm0, %v469_v32  ;;  %v247_v44 = vmul.f32 %v501_v36, %v443_v0  ;;  %v248_v45 = vmul.f32 %v504_v37, %v443_v0  ;;  %v249_v46 = vmul.f32 %v505_v38, %v443_v0 }
  0x20   : > { %v250_v47 = vmul.f32 %v508_v39, %v443_v0  ;;  %v251_v48 = vmul.f32 %v509_v40, %v443_v0  ;;  %v470_v49 = vpack.c.bf16 %v244_v41, %v244_v41  ;;  %v471_v50 = vpack.c.bf16 %v245_v42, %v245_v42 }
  0x21   : > { %v472_v51 = vpack.c.bf16 %v246_v43, %v246_v43  ;;  %v473_v52 = vpack.c.bf16 %v247_v44, %v247_v44  ;;  %v474_v53 = vpack.c.bf16 %v248_v45, %v248_v45  ;;  %v475_v54 = vpack.c.bf16 %v249_v46, %v249_v46 }
  0x22   : > { %v476_v55 = vpack.c.bf16 %v250_v47, %v250_v47  ;;  %v477_v56 = vpack.c.bf16 %v251_v48, %v251_v48  ;;  %325 = vst.msk [vmem:[%s657_s28 + $0x20] sm:$0xf] %vm316_vm0, %v470_v49  ;;  %326 = vst.msk [vmem:[%s657_s28 + $0x24] sm:$0xf] %vm316_vm0, %v471_v50 }
  0x23   : > { %327 = vst.msk [vmem:[%s657_s28 + $0x28] sm:$0xf] %vm316_vm0, %v472_v51  ;;  %328 = vst.msk [vmem:[%s657_s28 + $0x2c] sm:$0xf] %vm316_vm0, %v473_v52 }
  0x24   : > { %329 = vst.msk [vmem:[%s657_s28 + $0x30] sm:$0xf] %vm316_vm0, %v474_v53  ;;  %330 = vst.msk [vmem:[%s657_s28 + $0x34] sm:$0xf] %vm316_vm0, %v475_v54 }
  0x25   : > { %331 = vst.msk [vmem:[%s657_s28 + $0x38] sm:$0xf] %vm316_vm0, %v476_v55  ;;  %332 = vst.msk [vmem:[%s657_s28 + $0x3c] sm:$0xf] %vm316_vm0, %v477_v56 }
  0x26 PF: > { %s12_s13 = sadd.s32 1, %s595_s13   ;;  %s713_s9 = smov %s587_s11 }
  0x27   : > { %p9_p7 = scmp.ge.s32.totalorder %s12_s13, 6   ;;  %s714_s10 = smov %s591_s12 }
  0x28   : > { %s715_s11 = smov %s718_s14  ;;  %s716_s12 = smov %s722_s15 }
  0x29   :  { %11 = sbr.rel (!%p9_p7) target bundleno = 3 (0x3), region = 61 }

// kernel: attention_refinement.2
= control target key start
LH: loop header
LB: loop body
LE: loop exit
PB: predicated region body
PF: predicated region fallthrough
CT: control target
= control target key end

     0   :  { %s4060_s27 = smov 0   ;;  %s4062_s28 = smov 0   ;;  %s5168_s0 = inlined_call_operand.vmem [shape: bf16[2,18,18,4], index: 0, kind: input, shape index: {}]   ;;  %s5169_s1 = inlined_call_operand.vmem [shape: bf16[3,3,4,8], index: 1, kind: input, shape index: {}]   ;;  %s5170_s2 = inlined_call_operand.vmem [shape: f32[1,8], index: 2, kind: input, shape index: {}]   ;;  %s5171_s3 = inlined_call_operand.vmem [shape: f32[1,8], index: 3, kind: input, shape index: {}]   ;;  %s5172_s4 = inlined_call_operand.vmem [shape: bf16[8,8], index: 4, kind: input, shape index: {}]   ;;  %s5173_s5 = inlined_call_operand.vmem [shape: f32[1,8], index: 5, kind: input, shape index: {}]   ;;  %s5174_s6 = inlined_call_operand.vmem [shape: f32[1,8], index: 6, kind: input, shape index: {}]   ;;  %s5175_s7 = inlined_call_operand.vmem [shape: bf16[2,256,8], index: 7, kind: output, shape index: {0}]   ;;  %s5176_s8 = inlined_call_operand.vmem [shape: f32[2,1,8], index: 8, kind: output, shape index: {1}]  }
   0x1   :  { %s4064_s29 = smov 0   ;;  %s4066_s30 = smov 0  }
   0x2   :  { %s4068_s9 = smov 0  }
   0x3 LB: > { %s28_s10 = sadd.s32 1, %s4002_s29  ;;  %s31_s11 = sadd.s32 1, %s4006_s30  ;;  %s4010_s9 = sphi %s4068_s9, %s19_s9   ;;  %s4006_s30 = sphi %s4066_s30, %s5202_s30   ;;  %s4002_s29 = sphi %s4064_s29, %s5201_s29   ;;  %s3998_s28 = sphi %s4062_s28, %s5200_s28   ;;  %s3994_s27 = sphi %s4060_s27, %s5199_s27  }
   0x4   : > { %p29_p0 = scmp.ge.s32.totalorder %s28_s10, 2  ;;  %p3183_p1 = scmp.ge.s32.totalorder %s4010_s9, 1 }
   0x5   : > { %p279_p2 = scmp.lt.s32.totalorder %s4010_s9, 5 }
   0x6   : > { %s5204_s10 = smov (%p29_p0, %s28_s10), 0  ;;  %s5206_s11 = smov (!%p29_p0, %s31_s11), %s4006_s30 }
   0x7   : > { %p280_p3 = pnand %p3183_p1, %p279_p2  ;;  %p33_p4 = scmp.ge.s32.totalorder %s5206_s11, 2 }
   0x9   : > { %s5208_s11 = smov (%p33_p4, %s5206_s11), 0  ;;  %283 = sbr.rel (%p280_p3) target bundleno = 730 (0x2da), region = 48 }
  0x10   : > { %v3191_v0 = vld [vmem:[%s5169_s1 + $0x2] sm:$0x3]  ;;  %vm614_vm0 = vcmask 1041408   ;;  %v3308_v1 = vld [vmem:[%s5169_s1 + $0x8] sm:$0x3]  ;;  %p320_p5 = scmp.lt.s32.totalorder %s3998_s28, 1 }
  0x11   : > { %3889 = vmatprep.subr.msk.bf16.mxu1 %vm614_vm0, %v3191_v0  ;;  %3893 = vmatprep.subr.msk.bf16.mxu0 %vm614_vm0, %v3308_v1  ;;  %v616_v2 = vsel %vm614_vm0, %v3191_v0, 0  ;;  %v4102_v3 = vsel %vm614_vm0, %v3308_v1, 0  ;;  %s3185_s16 = sshll.u32 %s3994_s27, 4  ;;  %v359_v4 = vld [vmem:[%s5169_s1] sm:$0x3]  ;;  %s3491_s19 = smul.u32 96, %s3994_s27 }
  0x12   : > { %3592 = vmatpush3.bf16.msra.mxu1 %v616_v2  ;;  %3664 = vmatpush3.bf16.msra.mxu0 %v4102_v3  ;;  %s5210_s28 = smov (!%p320_p5, %s3998_s28), 1  ;;  %p328_p6 = scmp.lt.s32.totalorder %s3185_s16, 31  ;;  %v3341_v5 = vld [vmem:[%s5169_s1 + $0xa] sm:$0x3]  ;;  %vm368_vm1 = vsmask.f32 3328 }
  0x13   : > { %3890 = vmatprep.subr.msk.bf16.mxu1 %vm614_vm0, %v359_v4  ;;  %s3899_s22 = smul.u32 216, %s5210_s28  ;;  %s3186_s23 = sshll.u32 %s5210_s28, 5  ;;  %3895 = vmatprep.subr.msk.bf16.mxu0 %vm614_vm0, %v3341_v5  ;;  %vm369_vm2 = vsmask.f32 7440  ;;  %vm589_vm3 = vcmask 31744   ;;  %v4149_v16 = vsel %vm614_vm0, %v359_v4, 0 }
  0x14   : > { %s5212_s16 = smov (!%p328_p6, %s3185_s16), 31  ;;  %s4121_s14 = scalar_lea.vmem %s5176_s8, %s5210_s28  ;;  %v4158_v26 = vld [vmem:[%s5169_s1 + $0xc] sm:$0x3]  ;;  %vm4167_vm4 = vmor %vm368_vm1, %vm369_vm2  ;;  %v4175_v37 = vsel %vm614_vm0, %v3341_v5, 0  ;;  %vm903_vm5 = vcmask 1042432   ;;  %vm904_vm6 = vcmask 1046532  }
  0x15   : > { %s324_s26 = scalar_lea.vmem %s5168_s0, %s3899_s22  ;;  %s331_s15 = sadd.s32 %s3186_s23, %s5212_s16  ;;  %v4179_v41 = vsel %vm614_vm0, %v4158_v26, 0  ;;  %vm4322_vm7 = vmor %vm903_vm5, %vm904_vm6  ;;  %v4967_v32 = vld [vmem:[%s5170_s2] ss:$0 sm:$0xff] }
  0x16   : > { %s4123_s17 = scalar_lea.vmem %s324_s26, %s3491_s19  ;;  %s3187_s18 = sshll.u32 %s331_s15, 2 }
  0x17   : > { %v4126_v6 = vld [vmem:[%s4123_s17] sm:$0xf]  ;;  %v4129_v7 = vld [vmem:[%s4123_s17 + $0x4] sm:$0xf]  ;;  %s4134_s28 = scalar_lea.vmem %s5175_s7, %s3187_s18  ;;  %v4137_v8 = vld [vmem:[%s4123_s17 + $0x8] sm:$0x1] }
  0x18   : > { %v372_v9 = vshrl.u32 %v4126_v6, 16  ;;  %v375_v10 = vshll.u32 %v4126_v6, 16  ;;  %v381_v11 = vshll.u32 %v4129_v7, 16  ;;  %v385_v12 = vshrl.u32 %v4129_v7, 16  ;;  %v3284_v14 = vld [vmem:[%s4123_s17 + $0xc] sm:$0xf] }
  0x19   : > { %v391_v13 = vshll.u32 %v4137_v8, 16  ;;  %v4146_v15 = vld [vmem:[%s4123_s17 + $0x10] sm:$0xf]  ;;  %v4152_v21 = vld [vmem:[%s4123_s17 + $0x14] sm:$0x1]  ;;  %v1355_v23 = vshrl.u32 %v3284_v14, 16 }
  0x1a   : > { %v374_v17 = vrot.slane %v372_v9, 4  ;;  %v377_v18 = vrot.slane %v375_v10, 5  ;;  %v383_v19 = vrot.slane %v381_v11, 5  ;;  %v387_v20 = vrot.slane %v385_v12, 4  ;;  %v4163_v31 = vld [vmem:[%s4123_s17 + $0xc] sm:$0xf] }
  0x1b   : > { %v393_v22 = vrot.slane %v391_v13, 5  ;;  %v1358_v24 = vshll.u32 %v3284_v14, 16  ;;  %v1364_v25 = vshll.u32 %v4146_v15, 16  ;;  %v1368_v29 = vshrl.u32 %v4146_v15, 16  ;;  %v4172_v36 = vld [vmem:[%s4123_s17 + $0x10] sm:$0xf] }
  0x1c   : > { %v378_v27 = vor.u32 %v377_v18, %v374_v17  ;;  %v388_v28 = vor.u32 %v387_v20, %v383_v19  ;;  %v1374_v30 = vshll.u32 %v4152_v21, 16  ;;  %v1357_v33 = vrot.slane %v1355_v23, 4  ;;  %v4182_v44 = vld [vmem:[%s4123_s17 + $0x14] sm:$0x1]  ;;  %v3287_v55 = vld [vmem:[%s4123_s17 + $0x18] sm:$0xf] }
  0x1d   : > { %v1360_v34 = vrot.slane %v1358_v24, 5  ;;  %v1366_v35 = vrot.slane %v1364_v25, 5  ;;  %v1370_v40 = vrot.slane %v1368_v29, 4  ;;  %v396_v45 = vshrl.u32 %v4163_v31, 16  ;;  %v4195_v60 = vld [vmem:[%s4123_s17 + $0x1c] sm:$0xf] }
  0x1e   : > { %v379_v38 = vrot.slane %v378_v27, 4  ;;  %v389_v39 = vrot.slane %v388_v28, 4  ;;  %v1376_v43 = vrot.slane %v1374_v30, 5  ;;  %v399_v46 = vshll.u32 %v4163_v31, 16  ;;  %v4203_v1 = vld [vmem:[%s4123_s17 + $0x20] sm:$0x1] }
  0x1f   : > { %v1361_v42 = vor.u32 %v1360_v34, %v1357_v33  ;;  %v1371_v49 = vor.u32 %v1370_v40, %v1366_v35  ;;  %v405_v50 = vshll.u32 %v4172_v36, 16  ;;  %v398_v53 = vrot.slane %v396_v45, 4  ;;  %v4211_v20 = vld [vmem:[%s4123_s17 + $0x18] sm:$0xf]  ;;  %v4218_v27 = vld [vmem:[%s4123_s17 + $0x1c] sm:$0xf] }
  0x20   : > { %v384_v47 = vsel %vm4167_vm4, %v379_v38, %v383_v19  ;;  %v394_v48 = vsel %vm4167_vm4, %v389_v39, %v393_v22  ;;  %v401_v54 = vrot.slane %v399_v46, 5  ;;  %v409_v58 = vshrl.u32 %v4172_v36, 16  ;;  %v4226_v38 = vld [vmem:[%s4123_s17 + $0x20] sm:$0x1]  ;;  %p3469_p7 = scmp.ne.s32.totalorder %s3994_s27, 0 }
  0x21   : > { %v3192_v51 = vcombine.low %v384_v47, %v394_v48  ;;  %v1362_v52 = vrot.slane %v1361_v42, 4  ;;  %v1372_v56 = vrot.slane %v1371_v49, 4  ;;  %v407_v57 = vrot.slane %v405_v50, 5  ;;  %v3290_v47 = vld [vmem:[%s4123_s17 + $0x24] sm:$0xf] }
  0x22   : > { %v415_v59 = vshll.u32 %v4182_v44, 16  ;;  %v1746_v62 = vrot.slane %v4146_v15, 5  ;;  %v1749_v63 = vrot.slane %v4152_v21, 5  ;;  %v402_v0 = vor.u32 %v401_v54, %v398_v53 }
  0x23   : > { %3593 = vmatprep.mubr.msk.bf16.mxu1 %vm589_vm3, %v3192_v51  ;;  %v1367_v61 = vsel %vm4167_vm4, %v1362_v52, %v1366_v35  ;;  %v1377_v2 = vsel %vm4167_vm4, %v1372_v56, %v1376_v43  ;;  %v411_v4 = vrot.slane %v409_v58, 4  ;;  %v1379_v9 = vshrl.u32 %v3287_v55, 16  ;;  %v4236_v52 = vld [vmem:[%s4123_s17 + $0x28] sm:$0xf] }
  0x24   : > { %v417_v5 = vrot.slane %v415_v59, 5  ;;  %v3309_v10 = vcombine.low %v1367_v61, %v1377_v2  ;;  %v403_v11 = vrot.slane %v402_v0, 4  ;;  %v1382_v12 = vshll.u32 %v3287_v55, 16  ;;  %v4248_v61 = vld [vmem:[%s4123_s17 + $0x2c] sm:$0x1] }
  0x25   : > { %v1388_v13 = vshll.u32 %v4195_v60, 16  ;;  %v412_v14 = vor.u32 %v411_v4, %v407_v57  ;;  %v1381_v17 = vrot.slane %v1379_v9, 4  ;;  %v1392_v18 = vshrl.u32 %v4195_v60, 16 }
  0x26   : > { %v1398_v19 = vshll.u32 %v4203_v1, 16  ;;  %3665 = vmatprep.mubr.msk.bf16.mxu0 %vm589_vm3, %v3309_v10  ;;  %v408_v22 = vsel %vm4167_vm4, %v403_v11, %v407_v57  ;;  %v1384_v23 = vrot.slane %v1382_v12, 5  ;;  %v1753_v25 = vrot.slane %v4195_v60, 5  ;;  %v4242_v57 = vld [vmem:[%s5169_s1 + $0x4] sm:$0x3] }
  0x27   : > { %v1390_v24 = vrot.slane %v1388_v13, 5  ;;  %v413_v28 = vrot.slane %v412_v14, 4  ;;  %v1394_v29 = vrot.slane %v1392_v18, 4  ;;  %v1756_v33 = vrot.slane %v4203_v1, 5  ;;  %v4255_v11 = vld [vmem:[%s4123_s17 + $0x24] sm:$0xf] }
  0x28   : > { %v1400_v30 = vrot.slane %v1398_v19, 5  ;;  %v1385_v34 = vor.u32 %v1384_v23, %v1381_v17  ;;  %v4223_v35 = vrot.slane %v1753_v25, 4  ;;  %v420_v39 = vshrl.u32 %v4211_v20, 16  ;;  %v4258_v18 = vld [vmem:[%s4123_s17 + $0x28] sm:$0xf] }
  0x29   : > { %v423_v40 = vshll.u32 %v4211_v20, 16  ;;  %v418_v42 = vsel %vm4167_vm4, %v413_v28, %v417_v5  ;;  %v1395_v43 = vor.u32 %v1394_v29, %v1390_v24  ;;  %v429_v45 = vshll.u32 %v4218_v27, 16  ;;  %v4268_v29 = vld [vmem:[%s4123_s17 + $0x2c] sm:$0x1] }
  0x2a   : > { %v433_v46 = vshrl.u32 %v4218_v27, 16  ;;  %v3193_v48 = vcombine.low %v408_v22, %v418_v42  ;;  %v1386_v49 = vrot.slane %v1385_v34, 4  ;;  %v422_v50 = vrot.slane %v420_v39, 4 }
  0x2b   : > { %v425_v51 = vrot.slane %v423_v40, 5  ;;  %v1396_v53 = vrot.slane %v1395_v43, 4  ;;  %v431_v54 = vrot.slane %v429_v45, 5  ;;  %v439_v56 = vshll.u32 %v4226_v38, 16  ;;  %v3293_v45 = vld [vmem:[%s4123_s17 + $0x30] sm:$0xf] }
  0x2c   : > { %v435_v55 = vrot.slane %v433_v46, 4  ;;  %3594 = vmatmul.mubr.msk.bf16.vlgmr.msra.gmra.mrb[0].mxu1 %vm589_vm3, %v3193_v48  ;;  %v1391_v58 = vsel %vm4167_vm4, %v1386_v49, %v1390_v24  ;;  %v1403_v0 = vshrl.u32 %v3290_v47, 16  ;;  %v1406_v2 = vshll.u32 %v3290_v47, 16 }
  0x2d   : > { %v426_v59 = vor.u32 %v425_v51, %v422_v50  ;;  %3610 = vmatpush3.bf16.msra.mxu1 %v4149_v16  ;;  %v1401_v4 = vsel %vm4167_vm4, %v1396_v53, %v1400_v30  ;;  %v441_v9 = vrot.slane %v439_v56, 5  ;;  %v1412_v10 = vshll.u32 %v4236_v52, 16  ;;  %v4278_v50 = vld [vmem:[%s4123_s17 + $0x34] sm:$0xf] }
  0x2e   : > { %v436_v5 = vor.u32 %v435_v55, %v431_v54  ;;  %v3310_v12 = vcombine.low %v1391_v58, %v1401_v4  ;;  %v1405_v14 = vrot.slane %v1403_v0, 4  ;;  %v1408_v17 = vrot.slane %v1406_v2, 5  ;;  %3891 = vmatprep.subr.msk.bf16.mxu1 %vm614_vm0, %v4242_v57  ;;  %v4288_v58 = vld [vmem:[%s4123_s17 + $0x38] sm:$0x1] }
  0x2f   : > { %v427_v13 = vrot.slane %v426_v59, 4  ;;  %v1414_v19 = vrot.slane %v1412_v10, 5  ;;  %v1416_v22 = vshrl.u32 %v4236_v52, 16  ;;  %v1422_v23 = vshll.u32 %v4248_v61, 16 }
  0x30   : > { %v437_v16 = vrot.slane %v436_v5, 4  ;;  %3666 = vmatmul.mubr.msk.bf16.vlgmr.msra.gmra.mrb[0].mxu0 %vm589_vm3, %v3310_v12  ;;  %v1409_v28 = vor.u32 %v1408_v17, %v1405_v14  ;;  %v444_v30 = vshrl.u32 %v4255_v11, 16  ;;  %v447_v34 = vshll.u32 %v4255_v11, 16  ;;  %v4293_v14 = vld [vmem:[%s4123_s17 + $0x30] sm:$0xf] }
  0x31   : > { %v432_v24 = vsel %vm4167_vm4, %v427_v13, %v431_v54  ;;  %3682 = vmatpush3.bf16.msra.mxu0 %v4175_v37  ;;  %v1418_v40 = vrot.slane %v1416_v22, 4  ;;  %v1424_v42 = vrot.slane %v1422_v23, 5  ;;  %v453_v43 = vshll.u32 %v4258_v18, 16  ;;  %v4299_v23 = vld [vmem:[%s4123_s17 + $0x34] sm:$0xf] }
  0x32   : > { %v442_v39 = vsel %vm4167_vm4, %v437_v16, %v441_v9  ;;  %v1410_v47 = vrot.slane %v1409_v28, 4  ;;  %v446_v48 = vrot.slane %v444_v30, 4  ;;  %v449_v49 = vrot.slane %v447_v34, 5  ;;  %3896 = vmatprep.subr.msk.bf16.mxu0 %vm614_vm0, %v4158_v26 }
  0x33   : > { %v3194_v46 = vcombine.low %v432_v24, %v442_v39  ;;  %v1419_v37 = vor.u32 %v1418_v40, %v1414_v19  ;;  %v455_v51 = vrot.slane %v453_v43, 5  ;;  %v457_v53 = vshrl.u32 %v4258_v18, 16  ;;  %v4304_v39 = vld [vmem:[%s4123_s17 + $0x38] sm:$0x1] }
  0x34   : > { %v463_v54 = vshll.u32 %v4268_v29, 16  ;;  %v1415_v55 = vsel %vm4167_vm4, %v1410_v47, %v1414_v19  ;;  %v450_v56 = vor.u32 %v449_v49, %v446_v48  ;;  %v1427_v59 = vshrl.u32 %v3293_v45, 16 }
  0x35   : > { %3597 = vmatprep.mubr.msk.bf16.mxu1 %vm589_vm3, %v3194_v46  ;;  %v1430_v0 = vshll.u32 %v3293_v45, 16  ;;  %v1420_v2 = vrot.slane %v1419_v37, 4  ;;  %v459_v26 = vrot.slane %v457_v53, 4  ;;  %v1436_v5 = vshll.u32 %v4278_v50, 16  ;;  %v3325_v37 = vld [vmem:[%s4123_s17 + $0xc] sm:$0xe] }
  0x36   : > { %v465_v4 = vrot.slane %v463_v54, 5  ;;  %v451_v9 = vrot.slane %v450_v56, 4  ;;  %v1429_v10 = vrot.slane %v1427_v59, 4  ;;  %v1440_v13 = vshrl.u32 %v4278_v50, 16  ;;  %v4316_v56 = vld [vmem:[%s4123_s17 + $0x3c] sm:$0xf] }
  0x37   : > { %v1432_v12 = vrot.slane %v1430_v0, 5  ;;  %v1425_v17 = vsel %vm4167_vm4, %v1420_v2, %v1424_v42  ;;  %v460_v16 = vor.u32 %v459_v26, %v455_v51  ;;  %v1438_v19 = vrot.slane %v1436_v5, 5 }
  0x38   : > { %v1446_v22 = vshll.u32 %v4288_v58, 16  ;;  %v3311_v24 = vcombine.low %v1415_v55, %v1425_v17  ;;  %v456_v28 = vsel %vm4167_vm4, %v451_v9, %v455_v51  ;;  %v1442_v34 = vrot.slane %v1440_v13, 4  ;;  %v4330_v17 = vld [vmem:[%s4123_s17 + $0x44] sm:$0x1] }
  0x39   : > { %v1433_v30 = vor.u32 %v1432_v12, %v1429_v10  ;;  %v461_v40 = vrot.slane %v460_v16, 4  ;;  %v468_v42 = vshrl.u32 %v4293_v14, 16  ;;  %v471_v45 = vshll.u32 %v4293_v14, 16  ;;  %v3326_v16 = vld [vmem:[%s4123_s17 + $0x18] sm:$0xe] }
  0x3a   : > { %v1448_v43 = vrot.slane %v1446_v22, 5  ;;  %3669 = vmatprep.mubr.msk.bf16.mxu0 %vm589_vm3, %v3311_v24  ;;  %v1443_v47 = vor.u32 %v1442_v34, %v1438_v19  ;;  %v477_v48 = vshll.u32 %v4299_v23, 16  ;;  %v481_v49 = vshrl.u32 %v4299_v23, 16 }
  0x3b   : > { %v1434_v46 = vrot.slane %v1433_v30, 4  ;;  %v466_v51 = vsel %vm4167_vm4, %v461_v40, %v465_v4  ;;  %v470_v53 = vrot.slane %v468_v42, 4  ;;  %v473_v54 = vrot.slane %v471_v45, 5  ;;  %v4327_v4 = vld [vmem:[%s4123_s17 + $0x40] sm:$0xf] }
  0x3c   : > { %v487_v55 = vshll.u32 %v4304_v39, 16  ;;  %v3195_v59 = vcombine.low %v456_v28, %v466_v51  ;;  %v1444_v2 = vrot.slane %v1443_v47, 4  ;;  %v479_v26 = vrot.slane %v477_v48, 5  ;;  %v4341_v30 = vld [vmem:[%s4123_s17 + $0x48] sm:$0xf] }
  0x3d   : > { %v1439_v0 = vsel %vm4167_vm4, %v1434_v46, %v1438_v19  ;;  %v474_v9 = vor.u32 %v473_v54, %v470_v53  ;;  %v483_v10 = vrot.slane %v481_v49, 4  ;;  %v3333_v13 = vrot.slane %v3325_v37, 9 }
  0x3e   : > { %v489_v12 = vrot.slane %v487_v55, 5  ;;  %3598 = vmatmul.mubr.msk.bf16.gmra.mrb[4].mxu1 %vm589_vm3, %v3195_v59  ;;  %v1449_v19 = vsel %vm4167_vm4, %v1444_v2, %v1448_v43  ;;  %v1748_v22 = vrot.slane %v1746_v62, 4  ;;  %v492_v24 = vshrl.u32 %v4316_v56, 16  ;;  %v4369_v2 = vld [vmem:[%s4123_s17 + $0x50] sm:$0x1] }
  0x3f   : > { %v495_v28 = vshll.u32 %v4316_v56, 16  ;;  %v3312_v34 = vcombine.low %v1439_v0, %v1449_v19  ;;  %v475_v40 = vrot.slane %v474_v9, 4  ;;  %v484_v42 = vor.u32 %v483_v10, %v479_v26 }
  0x40   : > { %v1747_v45 = vsel %vm4322_vm7, %v3333_v13, %v1746_v62  ;;  %v1750_v43 = vsel %vm4322_vm7, %v1748_v22, %v1749_v63  ;;  %v494_v46 = vrot.slane %v492_v24, 4  ;;  %v501_v48 = vshll.u32 %v4327_v4, 16  ;;  %v4357_v62 = vld [vmem:[%s4123_s17 + $0x4c] sm:$0xf] }
  0x41   : > { %v497_v47 = vrot.slane %v495_v28, 5  ;;  %3670 = vmatmul.mubr.msk.bf16.gmra.mrb[4].mxu0 %vm589_vm3, %v3312_v34  ;;  %v480_v49 = vsel %vm4167_vm4, %v475_v40, %v479_v26  ;;  %v485_v37 = vrot.slane %v484_v42, 4  ;;  %v3342_v15 = vcombine.low %v1747_v45, %v1750_v43  ;;  %v4393_v40 = vld [vmem:[%s5169_s1 + $0xe] sm:$0x3] }
  0x42   : > { %v505_v51 = vshrl.u32 %v4327_v4, 16  ;;  %v503_v53 = vrot.slane %v501_v48, 5  ;;  %v511_v63 = vshll.u32 %v4330_v17, 16  ;;  %v3334_v54 = vrot.slane %v3326_v16, 9  ;;  %v3327_v16 = vld [vmem:[%s4123_s17 + $0x24] sm:$0xe] }
  0x43   : > { %v498_v21 = vor.u32 %v497_v47, %v494_v46  ;;  %v490_v55 = vsel %vm4167_vm4, %v485_v37, %v489_v12  ;;  %3683 = vmatprep.mubr.msk.bf16.mxu0 %vm589_vm3, %v3342_v15  ;;  %v1757_v0 = vsel %vm4322_vm7, %v4223_v35, %v1756_v33  ;;  %v516_v26 = vshrl.u32 %v4341_v30, 16  ;;  %v4379_v33 = vld [vmem:[%s4123_s17 + $0x54] sm:$0xf] }
  0x44   : > { %v507_v59 = vrot.slane %v505_v51, 4  ;;  %v3196_v9 = vcombine.low %v480_v49, %v490_v55  ;;  %v513_v13 = vrot.slane %v511_v63, 5  ;;  %v1754_v12 = vsel %vm4322_vm7, %v3334_v54, %v1753_v25  ;;  %v4388_v25 = vld [vmem:[%s4123_s17 + $0x58] sm:$0xf]  ;;  %v4404_v54 = vld [vmem:[%s4123_s17 + $0x5c] sm:$0x1] }
  0x45   : > { %v499_v10 = vrot.slane %v498_v21, 4  ;;  %v3343_v1 = vcombine.low %v1754_v12, %v1757_v0  ;;  %v518_v22 = vrot.slane %v516_v26, 4  ;;  %v519_v24 = vshll.u32 %v4341_v30, 16 }
  0x46   : > { %v508_v19 = vor.u32 %v507_v59, %v503_v53  ;;  %3601 = vmatprep.mubr.msk.bf16.mxu1 %vm589_vm3, %v3196_v9  ;;  %v525_v28 = vshll.u32 %v4357_v62, 16  ;;  %v529_v60 = vshrl.u32 %v4357_v62, 16  ;;  %v535_v34 = vshll.u32 %v4369_v2, 16 }
  0x47   : > { %v504_v35 = vsel %vm4167_vm4, %v499_v10, %v503_v53  ;;  %v521_v45 = vrot.slane %v519_v24, 5  ;;  %v3335_v43 = vrot.slane %v3327_v16, 9  ;;  %v1760_v46 = vrot.slane %v4236_v52, 5  ;;  %v3328_v10 = vld [vmem:[%s4123_s17 + $0x30] sm:$0xe] }
  0x48   : > { %v509_v42 = vrot.slane %v508_v19, 4  ;;  %v527_v47 = vrot.slane %v525_v28, 5  ;;  %v531_v48 = vrot.slane %v529_v60, 4  ;;  %v537_v49 = vrot.slane %v535_v34, 5 }
  0x49   : > { %v1763_v37 = vrot.slane %v4248_v61, 5  ;;  %3684 = vmatmul.mubr.msk.bf16.vlgmr.msra.gmra.mrb[0].mxu0 %vm589_vm3, %v3343_v1  ;;  %v522_v51 = vor.u32 %v521_v45, %v518_v22  ;;  %v1761_v21 = vsel %vm4322_vm7, %v3335_v43, %v1760_v46  ;;  %v1762_v53 = vrot.slane %v1760_v46, 4  ;;  %v4425_v45 = vld [vmem:[%s4123_s17 + $0x40] sm:$0xf]  ;;  %v4428_v43 = vld [vmem:[%s4123_s17 + $0x44] sm:$0x1] }
  0x4a   : > { %v514_v15 = vsel %vm4167_vm4, %v509_v42, %v513_v13  ;;  %3700 = vmatpush3.bf16.msra.mxu0 %v4179_v41  ;;  %v532_v52 = vor.u32 %v531_v48, %v527_v47  ;;  %v540_v55 = vshrl.u32 %v4379_v33, 16  ;;  %v543_v61 = vshll.u32 %v4379_v33, 16 }
  0x4b   : > { %v3197_v63 = vcombine.low %v504_v35, %v514_v15  ;;  %v523_v59 = vrot.slane %v522_v51, 4  ;;  %v1764_v0 = vsel %vm4322_vm7, %v1762_v53, %v1763_v37  ;;  %v549_v26 = vshll.u32 %v4388_v25, 16  ;;  %3897 = vmatprep.subr.msk.bf16.mxu0 %vm614_vm0, %v4393_v40  ;;  %v3329_v35 = vld [vmem:[%s4123_s17 + $0x3c] sm:$0xe] }
  0x4c   : > { %v553_v9 = vshrl.u32 %v4388_v25, 16  ;;  %v533_v41 = vrot.slane %v532_v52, 4  ;;  %v3344_v13 = vcombine.low %v1761_v21, %v1764_v0  ;;  %v542_v12 = vrot.slane %v540_v55, 4  ;;  %v3330_v0 = vld [vmem:[%s4123_s17 + $0x48] sm:$0xe] }
  0x4d   : > { %3602 = vmatmul.mubr.msk.bf16.gmra.mrb[8].mxu1 %vm589_vm3, %v3197_v63  ;;  %v545_v16 = vrot.slane %v543_v61, 5  ;;  %v528_v19 = vsel %vm4167_vm4, %v523_v59, %v527_v47  ;;  %v551_v1 = vrot.slane %v549_v26, 5  ;;  %v559_v24 = vshll.u32 %v4404_v54, 16  ;;  %v4443_v61 = vld [vmem:[%s4123_s17 + $0x4c] sm:$0xf] }
  0x4e   : > { %v555_v22 = vrot.slane %v553_v9, 4  ;;  %v538_v28 = vsel %vm4167_vm4, %v533_v41, %v537_v49  ;;  %3687 = vmatprep.mubr.msk.bf16.mxu0 %vm589_vm3, %v3344_v13  ;;  %v3336_v34 = vrot.slane %v3328_v10, 9  ;;  %v1767_v42 = vrot.slane %v4278_v50, 5  ;;  %v4446_v59 = vld [vmem:[%s4123_s17 + $0x50] sm:$0x1] }
  0x4f   : > { %v546_v60 = vor.u32 %v545_v16, %v542_v12  ;;  %v3198_v46 = vcombine.low %v528_v19, %v538_v28  ;;  %v561_v48 = vrot.slane %v559_v24, 5  ;;  %v1770_v37 = vrot.slane %v4288_v58, 5  ;;  %v4454_v12 = vld [vmem:[%s4123_s17 + $0x58] sm:$0xf]  ;;  %v4457_v16 = vld [vmem:[%s4123_s17 + $0x5c] sm:$0x1] }
  0x50   : > { %v556_v47 = vor.u32 %v555_v22, %v551_v1  ;;  %v1768_v49 = vsel %vm4322_vm7, %v3336_v34, %v1767_v42  ;;  %v1769_v51 = vrot.slane %v1767_v42, 4  ;;  %v3337_v21 = vrot.slane %v3329_v35, 9  ;;  %5186 = vst [vmem:[#allocation2_spill] sm:$0xff] %v4457_v16  ;;  %v4466_v35 = vld [vmem:[%s4123_s17 + $0x64] sm:$0xf] }
  0x51   : > { %v547_v15 = vrot.slane %v546_v60, 4  ;;  %3605 = vmatprep.mubr.msk.bf16.mxu1 %vm589_vm3, %v3198_v46  ;;  %v1774_v53 = vrot.slane %v4425_v45, 5  ;;  %v1777_v63 = vrot.slane %v4428_v43, 5  ;;  %v3208_v55 = vcombine.low %v4126_v6, %v4129_v7  ;;  %v3331_v6 = vld [vmem:[%s4123_s17 + $0x54] sm:$0xe]  ;;  %5187 = vst [vmem:[#allocation3_spill] sm:$0xff] %v4466_v35 }
  0x52   : > { %v557_v50 = vrot.slane %v556_v47, 4  ;;  %v1771_v58 = vsel %vm4322_vm7, %v1769_v51, %v1770_v37  ;;  %v1781_v22 = vrot.slane %v4443_v61, 5  ;;  %v1784_v24 = vrot.slane %v4446_v59, 5  ;;  %v4470_v60 = vld [vmem:[%s4123_s17 + $0x68] sm:$0x1] }
  0x53   : > { %v552_v52 = vsel %vm4167_vm4, %v547_v15, %v551_v1  ;;  %v3345_v9 = vcombine.low %v1768_v49, %v1771_v58  ;;  %v1775_v10 = vsel %vm4322_vm7, %v3337_v21, %v1774_v53  ;;  %v1776_v41 = vrot.slane %v1774_v53, 4  ;;  %5188 = vst [vmem:[#allocation4_spill] sm:$0xff] %v4470_v60 }
  0x54   : > { %v562_v26 = vsel %vm4167_vm4, %v557_v50, %v561_v48  ;;  %v3338_v1 = vrot.slane %v3330_v0, 9  ;;  %v1783_v42 = vrot.slane %v1781_v22, 4  ;;  %v3339_v46 = vrot.slane %v3331_v6, 9  ;;  %v3332_v48 = vld [vmem:[%s4123_s17 + $0x60] sm:$0xe] }
  0x55   : > { %v3199_v13 = vcombine.low %v552_v52, %v562_v26  ;;  %3688 = vmatmul.mubr.msk.bf16.gmra.mrb[4].mxu0 %vm589_vm3, %v3345_v9  ;;  %v1778_v19 = vsel %vm4322_vm7, %v1776_v41, %v1777_v63  ;;  %v1788_v47 = vrot.slane %v4454_v12, 5  ;;  %v915_v37 = vrot.slane %v4172_v36, 5  ;;  %v880_v63 = vld [vmem:[%s4123_s17 + $0xc] sm:$0xe]  ;;  %v881_v0 = vld [vmem:[%s4123_s17 + $0x18] sm:$0xe] }
  0x56   : > { %v3346_v28 = vcombine.low %v1775_v10, %v1778_v19  ;;  %v1782_v34 = vsel %vm4322_vm7, %v3338_v1, %v1781_v22  ;;  %v1013_v15 = vsel %vm614_vm0, %v4242_v57, 0  ;;  %v1791_v49 = vrot.slane %v4457_v16, 5  ;;  %v882_v6 = vld [vmem:[%s4123_s17 + $0x24] sm:$0xe]  ;;  %v4776_v16 = vld [vmem:[%s4123_s17 + $0x70] sm:$0xf] }
  0x57   : > { %3606 = vmatmul.mubr.msk.bf16.gmra.mrb[12].mxu1 %vm589_vm3, %v3199_v13  ;;  %v1785_v51 = vsel %vm4322_vm7, %v1783_v42, %v1784_v24  ;;  %v1789_v21 = vsel %vm4322_vm7, %v3339_v46, %v1788_v47  ;;  %v1790_v50 = vrot.slane %v1788_v47, 4  ;;  %v1795_v53 = vrot.slane %v4466_v35, 5  ;;  %v883_v24 = vld [vmem:[%s4123_s17 + $0x30] sm:$0xe] }
  0x58   : > { %3611 = vmatprep.mubr.msk.bf16.mxu1 %vm589_vm3, %v3208_v55  ;;  %3691 = vmatprep.mubr.msk.bf16.mxu0 %vm589_vm3, %v3346_v28  ;;  %v3209_v52 = vcombine.low %v4163_v31, %v4172_v36  ;;  %v3347_v58 = vcombine.low %v1782_v34, %v1785_v51  ;;  %v3340_v55 = vrot.slane %v3332_v48, 9  ;;  %v1798_v57 = vrot.slane %v4470_v60, 5  ;;  %v4502_v31 = vld [vmem:[%s5169_s1 + $0x6] sm:$0x3] }
  0x59   : > { %v918_v26 = vrot.slane %v4182_v44, 5  ;;  %v3210_v9 = vcombine.low %v4211_v20, %v4218_v27  ;;  %v1792_v10 = vsel %vm4322_vm7, %v1790_v50, %v1791_v49  ;;  %v1797_v41 = vrot.slane %v1795_v53, 4  ;;  %v4748_v60 = vld [vmem:[%s4123_s17 + $0x64] sm:$0xf] }
  0x5a   : > { %v3348_v13 = vcombine.low %v1789_v21, %v1792_v10  ;;  %v3225_v36 = vrot.slane %v880_v63, 9  ;;  %v917_v19 = vrot.slane %v915_v37, 4  ;;  %v3226_v44 = vrot.slane %v881_v0, 9  ;;  %v3948_v21 = vld [vmem:[%s4123_s17 + $0x18] sm:$0xff]   ;;  %5189 = vst [vmem:[#allocation5_spill] sm:$0xff] %v4748_v60 }
  0x5b   : > { %v1796_v20 = vsel %vm4322_vm7, %v3340_v55, %v1795_v53  ;;  %v1799_v1 = vsel %vm4322_vm7, %v1797_v41, %v1798_v57  ;;  %v922_v22 = vrot.slane %v4218_v27, 5  ;;  %v925_v42 = vrot.slane %v4226_v38, 5  ;;  %v3950_v41 = vld [vmem:[%s4123_s17 + $0x24] sm:$0xff]  }
  0x5c   : > { %v4515_v28 = vsel %vm4322_vm7, %v3225_v36, %v915_v37  ;;  %v4519_v34 = vsel %vm4322_vm7, %v917_v19, %v918_v26  ;;  %v3227_v46 = vrot.slane %v882_v6, 9  ;;  %v3349_v37 = vcombine.low %v1796_v20, %v1799_v1  ;;  %v3393_v26 = vld [vmem:[%s4123_s17 + $0x18] sm:$0xf]  ;;  %v4576_v6 = vld [vmem:[%s4123_s17 + $0x1c] sm:$0xf] }
  0x5d   : > { %3692 = vmatmul.mubr.msk.bf16.gmra.mrb[8].mxu0 %vm589_vm3, %v3347_v58  ;;  %v3234_v27 = vcombine.low %v4515_v28, %v4519_v34  ;;  %v4528_v47 = vsel %vm4322_vm7, %v3226_v44, %v922_v22  ;;  %v924_v48 = vrot.slane %v922_v22, 4  ;;  %v932_v49 = vrot.slane %v4268_v29, 5 }
  0x5e   : > { %3695 = vmatprep.mubr.msk.bf16.mxu0 %vm589_vm3, %v3348_v13  ;;  %v3228_v38 = vrot.slane %v883_v24, 9  ;;  %v3211_v51 = vcombine.low %v4255_v11, %v4258_v18  ;;  %v936_v53 = vrot.slane %v4299_v23, 5  ;;  %v939_v63 = vrot.slane %v4304_v39, 5  ;;  %v885_v24 = vld [vmem:[%s4123_s17 + $0x48] sm:$0xe] }
  0x5f   : > { %3612 = vmatmul.mubr.msk.bf16.vlgmr.msra.gmra.mrb[0].mxu1 %vm589_vm3, %v3209_v52  ;;  %v4537_v50 = vsel %vm4322_vm7, %v924_v48, %v925_v42  ;;  %v3212_v52 = vcombine.low %v4293_v14, %v4299_v23  ;;  %v908_v55 = vrot.slane %v4129_v7, 5  ;;  %v879_v14 = vld [vmem:[%s4123_s17] sm:$0xe]  ;;  %v911_v10 = vrot.slane %v4137_v8, 5 }
  0x60   : > { %3628 = vmatpush3.bf16.msra.mxu1 %v1013_v15  ;;  %3615 = vmatprep.mubr.msk.bf16.mxu1 %vm589_vm3, %v3210_v9  ;;  %v929_v15 = vrot.slane %v4258_v18, 5  ;;  %v3235_v29 = vcombine.low %v4528_v47, %v4537_v50  ;;  %v884_v18 = vld [vmem:[%s4123_s17 + $0x3c] sm:$0xe]  ;;  %v4553_v39 = vsel %vm4322_vm7, %v3228_v38, %v936_v53  ;;  %v938_v57 = vrot.slane %v936_v53, 4  ;;  %v4601_v38 = vld [vmem:[%s5169_s1 + $0x10] sm:$0x3] }
  0x61   : > { %3892 = vmatprep.subr.msk.bf16.mxu1 %vm614_vm0, %v4502_v31  ;;  %v3229_v9 = vrot.slane %v884_v18, 9  ;;  %v3224_v36 = vrot.slane %v879_v14, 9  ;;  %v910_v19 = vrot.slane %v908_v55, 4  ;;  %v943_v44 = vrot.slane %v4327_v4, 5  ;;  %v4622_v14 = vld [vmem:[%s4123_s17 + $0x28] sm:$0xf] }
  0x62   : > { %v4547_v58 = vsel %vm4322_vm7, %v3227_v46, %v929_v15  ;;  %v931_v11 = vrot.slane %v929_v15, 4  ;;  %v4567_v0 = vsel %vm4322_vm7, %v938_v57, %v939_v63  ;;  %v946_v20 = vrot.slane %v4330_v17, 5  ;;  %v4724_v47 = vld [vmem:[%s4123_s17 + $0x44] sm:$0x1]  ;;  %v3411_v7 = vld [vmem:[%s4123_s17 + $0x60] sm:$0xf] }
  0x63   : > { %v3213_v1 = vcombine.low %v4316_v56, %v4327_v4  ;;  %v2193_v22 = vshrl.u32 %v3393_v26, 16  ;;  %v2196_v8 = vshll.u32 %v3393_v26, 16  ;;  %v2202_v42 = vshll.u32 %v4576_v6, 16  ;;  %v3952_v56 = vld [vmem:[%s4123_s17 + $0x30] sm:$0xff]  }
  0x64   : > { %v4559_v23 = vsel %vm4322_vm7, %v931_v11, %v932_v49  ;;  %v2206_v46 = vshrl.u32 %v4576_v6, 16  ;;  %v4587_v48 = vsel %vm4322_vm7, %v3229_v9, %v943_v44  ;;  %v2435_v15 = vsel %vm614_vm0, %v4393_v40, 0 }
  0x65   : > { %3696 = vmatmul.mubr.msk.bf16.gmra.mrb[12].mxu0 %vm589_vm3, %v3349_v37  ;;  %v945_v37 = vrot.slane %v943_v44, 4  ;;  %v3214_v17 = vcombine.low %v4341_v30, %v4357_v62  ;;  %v909_v4 = vsel %vm4322_vm7, %v3224_v36, %v908_v55  ;;  %v912_v49 = vsel %vm4322_vm7, %v910_v19, %v911_v10  ;;  %v4609_v30 = vld [vmem:[%s4123_s17 + $0x20] sm:$0x1]  ;;  %v3396_v55 = vld [vmem:[%s4123_s17 + $0x24] sm:$0xf] }
  0x66   : > { %3701 = vmatprep.mubr.msk.bf16.mxu0 %vm589_vm3, %v3948_v21  ;;  %v3230_v40 = vrot.slane %v885_v24, 9  ;;  %v2195_v21 = vrot.slane %v2193_v22, 4  ;;  %v2198_v53 = vrot.slane %v2196_v8, 5  ;;  %v4615_v11 = vrot.slane %v2202_v42, 5  ;;  %v886_v36 = vld [vmem:[%s4123_s17 + $0x54] sm:$0xe] }
  0x67   : > { %3616 = vmatmul.mubr.msk.bf16.gmra.mrb[4].mxu1 %vm589_vm3, %v3211_v51  ;;  %v4605_v51 = vsel %vm4322_vm7, %v945_v37, %v946_v20  ;;  %v2208_v18 = vrot.slane %v2206_v46, 4  ;;  %v953_v57 = vrot.slane %v4369_v2, 5  ;;  %v3215_v9 = vcombine.low %v4379_v33, %v4388_v25  ;;  %v3399_v2 = vld [vmem:[%s4123_s17 + $0x30] sm:$0xf]  ;;  %v3954_v19 = vld [vmem:[%s4123_s17 + $0x3c] sm:$0xff]   ;;  %v3955_v24 = vld [vmem:[%s4123_s17 + $0x48] sm:$0xff]  }
  0x68   : > { %3619 = vmatprep.mubr.msk.bf16.mxu1 %vm589_vm3, %v3212_v52  ;;  %v950_v52 = vrot.slane %v4357_v62, 5  ;;  %v3233_v10 = vcombine.low %v909_v4, %v912_v49  ;;  %v2199_v44 = vor.u32 %v2198_v53, %v2195_v21  ;;  %v2217_v20 = vshrl.u32 %v3396_v55, 16  ;;  %v4641_v8 = vld [vmem:[%s4123_s17 + $0x34] sm:$0xf] }
  0x69   : > { %v2209_v33 = vor.u32 %v2208_v18, %v4615_v11  ;;  %v2226_v42 = vshll.u32 %v4622_v14, 16  ;;  %v2230_v46 = vshrl.u32 %v4622_v14, 16  ;;  %v957_v4 = vrot.slane %v4388_v25, 5 }
  0x6a   : > { %v4626_v62 = vsel %vm4322_vm7, %v3230_v40, %v950_v52  ;;  %v952_v26 = vrot.slane %v950_v52, 4  ;;  %v2250_v49 = vshll.u32 %v4641_v8, 16  ;;  %v2254_v40 = vshrl.u32 %v4641_v8, 16 }
  0x6b   : > { %v960_v21 = vrot.slane %v4404_v54, 5  ;;  %v2200_v53 = vrot.slane %v2199_v44, 4  ;;  %v2210_v25 = vrot.slane %v2209_v33, 4  ;;  %v4671_v44 = vld [vmem:[%s4123_s17 + $0x38] sm:$0x1]  ;;  %v1215_v33 = vsel %vm614_vm0, %v4502_v31, 0 }
  0x6c   : > { %v4638_v22 = vsel %vm4322_vm7, %v952_v26, %v953_v57  ;;  %v2219_v57 = vrot.slane %v2217_v20, 4  ;;  %v4660_v26 = vrot.slane %v2226_v42, 5  ;;  %v4673_v20 = vrot.slane %v2250_v49, 5  ;;  %v3956_v42 = vld [vmem:[%s4123_s17 + $0x54] sm:$0xff]  }
  0x6d   : > { %3702 = vmatmul.mubr.msk.bf16.vlgmr.msra.gmra.mrb[0].mxu0 %vm589_vm3, %v3950_v41  ;;  %v2212_v41 = vshll.u32 %v4609_v30, 16  ;;  %vm2870_vm8 = vcmask (!%p3469_p7), 57344  }
  0x6e   : > { %3718 = vmatpush3.bf16.msra.mxu0 %v2435_v15  ;;  %3705 = vmatprep.mubr.msk.bf16.mxu0 %vm589_vm3, %v3952_v56  ;;  %v2241_v15 = vshrl.u32 %v3399_v2, 16  ;;  %v3231_v56 = vrot.slane %v886_v36, 9 }
  0x6f   : > { %3620 = vmatmul.mubr.msk.bf16.gmra.mrb[8].mxu1 %vm589_vm3, %v3213_v1  ;;  %3898 = vmatprep.subr.msk.bf16.mxu0 %vm614_vm0, %v4601_v38  ;;  %v2220_v1 = vshll.u32 %v3396_v55, 16  ;;  %v2214_v52 = vrot.slane %v2212_v41, 5  ;;  %v959_v55 = vrot.slane %v957_v4, 4  ;;  %v4664_v41 = vld [vmem:[%s4123_s17 + $0x2c] sm:$0x1] }
  0x70   : > { %3623 = vmatprep.mubr.msk.bf16.mxu1 %vm589_vm3, %v3214_v17  ;;  %v2244_v17 = vshll.u32 %v3399_v2, 16  ;;  %v4656_v18 = vsel %vm4322_vm7, %v3231_v56, %v957_v4  ;;  %v2232_v2 = vrot.slane %v2230_v46, 4  ;;  %v2243_v36 = vrot.slane %v2241_v15, 4  ;;  %v4682_v46 = vld [vmem:[%s4123_s17 + $0x40] sm:$0xf] }
  0x71   : > { %v2222_v54 = vrot.slane %v2220_v1, 5  ;;  %v2256_v1 = vrot.slane %v2254_v40, 4  ;;  %v3957_v15 = vld [vmem:[%s4123_s17 + $0x60] sm:$0xff]   ;;  %v2215_v56 = vsel %vm4167_vm4, %v2210_v25, %v2214_v52  ;;  %v2236_v49 = vshll.u32 %v4664_v41, 16  ;;  %v3405_v40 = vld [vmem:[%s4123_s17 + $0x48] sm:$0xf] }
  0x72   : > { %v2289_v52 = vshrl.u32 %v3405_v40, 16  ;;  %v2292_v25 = vshll.u32 %v3405_v40, 16 }
  0x73   : > { %v2223_v4 = vor.u32 %v2222_v54, %v2219_v57  ;;  %v2257_v63 = vor.u32 %v2256_v1, %v4673_v20  ;;  %v3408_v1 = vld [vmem:[%s4123_s17 + $0x54] sm:$0xf] }
  0x74   : > { %v2291_v50 = vrot.slane %v2289_v52, 4  ;;  %v2316_v40 = vshll.u32 %v3408_v1, 16 }
  0x75   : > { %3706 = vmatmul.mubr.msk.bf16.gmra.mrb[4].mxu0 %vm589_vm3, %v3954_v19  ;;  %v2246_v19 = vrot.slane %v2244_v17, 5  ;;  %v2205_v17 = vsel %vm4167_vm4, %v2200_v53, %v4615_v11  ;;  %v2274_v11 = vshll.u32 %v4682_v46, 16  ;;  %v2278_v53 = vshrl.u32 %v4682_v46, 16 }
  0x76   : > { %3709 = vmatprep.mubr.msk.bf16.mxu0 %vm589_vm3, %v3955_v24  ;;  %v2260_v24 = vshll.u32 %v4671_v44, 16  ;;  %v3418_v54 = vcombine.low %v2205_v17, %v2215_v56  ;;  %v2258_v17 = vrot.slane %v2257_v63, 4  ;;  %v4729_v63 = vld [vmem:[%s4123_s17 + $0x50] sm:$0x1] }
  0x77   : > { %3624 = vmatmul.mubr.msk.bf16.gmra.mrb[12].mxu1 %vm589_vm3, %v3215_v9  ;;  %v4668_v9 = vsel %vm4322_vm7, %v959_v55, %v960_v21  ;;  %v4693_v21 = vld [vmem:[%s4123_s17 + $0x4c] sm:$0xf]  ;;  %v2233_v55 = vor.u32 %v2232_v2, %v4660_v26  ;;  %v2247_v31 = vor.u32 %v2246_v19, %v2243_v36  ;;  %v2224_v2 = vrot.slane %v2223_v4, 4 }
  0x78   : > { %3629 = vmatprep.mubr.msk.bf16.mxu1 %vm589_vm3, %v3233_v10  ;;  %v3402_v10 = vld [vmem:[%s4123_s17 + $0x3c] sm:$0xf]  ;;  %v2298_v57 = vshll.u32 %v4693_v21, 16  ;;  %v2238_v36 = vrot.slane %v2236_v49, 5  ;;  %v2302_v19 = vshrl.u32 %v4693_v21, 16  ;;  %v2262_v28 = vrot.slane %v2260_v24, 5 }
  0x79   : > { %v2265_v37 = vshrl.u32 %v3402_v10, 16  ;;  %v2268_v13 = vshll.u32 %v3402_v10, 16  ;;  %v2234_v10 = vrot.slane %v2233_v55, 4  ;;  %v4717_v4 = vrot.slane %v2274_v11, 5 }
  0x7a   : > { %v2280_v49 = vrot.slane %v2278_v53, 4  ;;  %v2313_v24 = vshrl.u32 %v3408_v1, 16  ;;  %v1484_v11 = vshll.u32 %v4443_v61, 16  ;;  %v2229_v53 = vsel %vm4167_vm4, %v2224_v2, %v4660_v26 }
  0x7b   : > { %v2267_v34 = vrot.slane %v2265_v37, 4  ;;  %v2270_v56 = vrot.slane %v2268_v13, 5  ;;  %v4726_v37 = vrot.slane %v2298_v57, 5  ;;  %v2304_v13 = vrot.slane %v2302_v19, 4 }
  0x7c   : > { %v2239_v52 = vsel %vm4167_vm4, %v2234_v10, %v2238_v36  ;;  %v2281_v1 = vor.u32 %v2280_v49, %v4717_v4  ;;  %v2263_v26 = vsel %vm4167_vm4, %v2258_v17, %v2262_v28  ;;  %v2315_v36 = vrot.slane %v2313_v24, 4  ;;  %v4767_v17 = vld [vmem:[%s4123_s17 + $0x5c] sm:$0x1] }
  0x7d   : > { %3710 = vmatmul.mubr.msk.bf16.gmra.mrb[8].mxu0 %vm589_vm3, %v3956_v42  ;;  %v2248_v42 = vrot.slane %v2247_v31, 4  ;;  %v2271_v19 = vor.u32 %v2270_v56, %v2267_v34  ;;  %v2305_v10 = vor.u32 %v2304_v13, %v4726_v37  ;;  %v5191_v28 = vcombine.low %v4553_v39, %v4567_v0 }
  0x7e   : > { %3713 = vmatprep.mubr.msk.bf16.mxu0 %vm589_vm3, %v3957_v15  ;;  %v3958_v15 = vld [vmem:[%s4123_s17 + $0x6c] sm:$0xff]   ;;  %v2337_v56 = vshrl.u32 %v3411_v7, 16  ;;  %v1488_v49 = vshrl.u32 %v4443_v61, 16  ;;  %v3419_v13 = vcombine.low %v2229_v53, %v2239_v52 }
  0x7f   : > { %3630 = vmatmul.mubr.msk.bf16.vlgmr.msra.gmra.mrb[0].mxu1 %vm589_vm3, %v3234_v27  ;;  %v4714_v27 = vld [vmem:[%s4123_s17 + $0x58] sm:$0xf]  ;;  %v2253_v57 = vsel %vm4167_vm4, %v2248_v42, %v4673_v20  ;;  %v5190_v20 = vcombine.low %v4547_v58, %v4559_v23  ;;  %v2318_v42 = vrot.slane %v2316_v40, 5  ;;  %v2340_v58 = vshll.u32 %v3411_v7, 16 }
  0x80   : > { %3646 = vmatpush3.bf16.msra.mxu1 %v1215_v33  ;;  %3633 = vmatprep.mubr.msk.bf16.mxu1 %vm589_vm3, %v3235_v29  ;;  %v3967_v33 = vld [vmem:[%s5169_s1 + $0x8] sm:$0x3]  ;;  %v2294_v29 = vrot.slane %v2292_v25, 5  ;;  %v2322_v55 = vshll.u32 %v4714_v27, 16  ;;  %v2326_v31 = vshrl.u32 %v4714_v27, 16  ;;  %v2689_v25 = vsel %vm614_vm0, %v4601_v38, 0 }
  0x81   : > { %3894 = vmatprep.subr.msk.bf16.mxu1 %vm614_vm0, %v3967_v33  ;;  %v2284_v33 = vshll.u32 %v4724_v47, 16  ;;  %v2308_v38 = vshll.u32 %v4729_v63, 16  ;;  %v2346_v23 = vshll.u32 %v4748_v60, 16  ;;  %v3420_v40 = vcombine.low %v2253_v57, %v2263_v26 }
  0x82   : > { %v2295_v2 = vor.u32 %v2294_v29, %v2291_v50  ;;  %v4760_v34 = vrot.slane %v2322_v55, 5  ;;  %v2272_v50 = vrot.slane %v2271_v19, 4  ;;  %v2282_v29 = vrot.slane %v2281_v1, 4 }
  0x83   : > { %v2286_v24 = vrot.slane %v2284_v33, 5  ;;  %v2310_v0 = vrot.slane %v2308_v38, 5  ;;  %v2306_v55 = vrot.slane %v2305_v10, 4  ;;  %v2332_v7 = vshll.u32 %v4767_v17, 16  ;;  %v4788_v33 = vld [vmem:[%s4123_s17 + $0x68] sm:$0x1] }
  0x84   : > { %v2296_v39 = vrot.slane %v2295_v2, 4  ;;  %v2339_v35 = vrot.slane %v2337_v56, 4  ;;  %v4778_v61 = vrot.slane %v2346_v23, 5  ;;  %v4780_v1 = vrot.slane %v1484_v11, 5 }
  0x85   : > { %3714 = vmatmul.mubr.msk.bf16.gmra.mrb[12].mxu0 %vm589_vm3, %v3958_v15  ;;  %v2328_v15 = vrot.slane %v2326_v31, 4  ;;  %v2319_v31 = vor.u32 %v2318_v42, %v2315_v36  ;;  %v1490_v53 = vrot.slane %v1488_v49, 4  ;;  %v2277_v52 = vsel %vm4167_vm4, %v2272_v50, %v4717_v4 }
  0x86   : > { %3719 = vmatprep.mubr.msk.bf16.mxu0 %vm589_vm3, %v3418_v54  ;;  %v2350_v54 = vshrl.u32 %v4748_v60, 16  ;;  %v2342_v60 = vrot.slane %v2340_v58, 5  ;;  %v2287_v57 = vsel %vm4167_vm4, %v2282_v29, %v2286_v24  ;;  %v2370_v38 = vshll.u32 %v4776_v16, 16  ;;  %v3959_v24 = vld [vmem:[%s4123_s17 + $0xc] sm:$0xff]  }
  0x87   : > { %3634 = vmatmul.mubr.msk.bf16.gmra.mrb[4].mxu1 %vm589_vm3, %v5190_v20  ;;  %v2329_v20 = vor.u32 %v2328_v15, %v4760_v34  ;;  %v2374_v36 = vshrl.u32 %v4776_v16, 16  ;;  %v5192_v11 = vcombine.low %v4587_v48, %v4605_v51  ;;  %v2301_v4 = vsel %vm4167_vm4, %v2296_v39, %v4726_v37 }
  0x88   : > { %3637 = vmatprep.mubr.msk.bf16.mxu1 %vm589_vm3, %v5191_v28  ;;  %v3414_v28 = vld [vmem:[%s4123_s17 + $0x6c] sm:$0xf]  ;;  %v2352_v19 = vrot.slane %v2350_v54, 4  ;;  %v2311_v10 = vsel %vm4167_vm4, %v2306_v55, %v2310_v0  ;;  %v2320_v42 = vrot.slane %v2319_v31, 4  ;;  %v2334_v15 = vrot.slane %v2332_v7, 5 }
  0x89   : > { %v2361_v26 = vshrl.u32 %v3414_v28, 16  ;;  %v2364_v2 = vshll.u32 %v3414_v28, 16  ;;  %v5193_v56 = vcombine.low %v4626_v62, %v4638_v22  ;;  %v2330_v48 = vrot.slane %v2329_v20, 4  ;;  %v3299_v20 = vld [vmem:[%s4123_s17 + $0x48] sm:$0xf] }
  0x8a   : > { %v2343_v51 = vor.u32 %v2342_v60, %v2339_v35  ;;  %v2356_v37 = vshll.u32 %v4788_v33, 16  ;;  %v1491_v58 = vor.u32 %v1490_v53, %v4780_v1  ;;  %v1494_v23 = vshll.u32 %v4446_v59, 16  ;;  %v4817_v60 = vld [vmem:[%s4123_s17 + $0x74] sm:$0x1] }
  0x8b   : > { %v3421_v54 = vcombine.low %v2277_v52, %v2287_v57  ;;  %v2363_v49 = vrot.slane %v2361_v26, 4  ;;  %v2366_v62 = vrot.slane %v2364_v2, 5  ;;  %v4811_v22 = vrot.slane %v2370_v38, 5 }
  0x8c   : > { %v2376_v50 = vrot.slane %v2374_v36, 4  ;;  %v3422_v29 = vcombine.low %v2301_v4, %v2311_v10  ;;  %v2325_v35 = vsel %vm4167_vm4, %v2320_v42, %v4760_v34  ;;  %v2344_v59 = vrot.slane %v2343_v51, 4  ;;  %v3961_v51 = vld [vmem:[%s4123_s17 + $0x24] sm:$0xff]  }
  0x8d   : > { %3720 = vmatmul.mubr.msk.bf16.vlgmr.msra.gmra.mrb[0].mxu0 %vm589_vm3, %v3419_v13  ;;  %v2335_v13 = vsel %vm4167_vm4, %v2330_v48, %v2334_v15  ;;  %v2358_v39 = vrot.slane %v2356_v37, 5  ;;  %v1492_v0 = vrot.slane %v1491_v58, 4  ;;  %v1496_v55 = vrot.slane %v1494_v23, 5 }
  0x8e   : > { %3736 = vmatpush3.bf16.msra.mxu0 %v2689_v25  ;;  %3723 = vmatprep.mubr.msk.bf16.mxu0 %vm589_vm3, %v3420_v40  ;;  %v2353_v25 = vor.u32 %v2352_v19, %v4778_v61  ;;  %v2584_v31 = vrot.slane %v4576_v6, 5  ;;  %v2367_v7 = vor.u32 %v2366_v62, %v2363_v49  ;;  %v2377_v28 = vor.u32 %v2376_v50, %v4811_v22  ;;  %v3434_v19 = vld [vmem:[%s4123_s17 + $0x18] sm:$0xe]  ;;  %v3436_v62 = vld [vmem:[%s4123_s17 + $0x30] sm:$0xe] }
  0x8f   : > { %3638 = vmatmul.mubr.msk.bf16.gmra.mrb[8].mxu1 %vm589_vm3, %v5192_v11  ;;  %v2380_v34 = vshll.u32 %v4817_v60, 16  ;;  %v5194_v53 = vcombine.low %v4656_v18, %v4668_v9  ;;  %v3423_v52 = vcombine.low %v2325_v35, %v2335_v13  ;;  %v2349_v6 = vsel %vm4167_vm4, %v2344_v59, %v4778_v61  ;;  %v3960_v61 = vld [vmem:[%s4123_s17 + $0x18] sm:$0xff]  }
  0x90   : > { %3641 = vmatprep.mubr.msk.bf16.mxu1 %vm589_vm3, %v5193_v56  ;;  %v2354_v40 = vrot.slane %v2353_v25, 4  ;;  %v1475_v26 = vshrl.u32 %v3299_v20, 16  ;;  %v1478_v2 = vshll.u32 %v3299_v20, 16  ;;  %v3442_v18 = vrot.slane %v3434_v19, 9  ;;  %v3296_v56 = vld [vmem:[%s4123_s17 + $0x3c] sm:$0xf] }
  0x91   : > { %v2586_v9 = vrot.slane %v2584_v31, 4  ;;  %v2587_v38 = vrot.slane %v4609_v30, 5  ;;  %v1497_v36 = vsel %vm4167_vm4, %v1492_v0, %v1496_v55  ;;  %v2368_v11 = vrot.slane %v2367_v7, 4  ;;  %v3435_v30 = vld [vmem:[%s4123_s17 + $0x24] sm:$0xe]  ;;  %v3962_v20 = vld [vmem:[%s4123_s17 + $0x30] sm:$0xff]  }
  0x92   : > { %v2359_v57 = vsel %vm4167_vm4, %v2354_v40, %v2358_v39  ;;  %v2378_v4 = vrot.slane %v2377_v28, 4  ;;  %v2382_v10 = vrot.slane %v2380_v34, 5  ;;  %v1477_v42 = vrot.slane %v1475_v26, 4  ;;  %v3963_v19 = vld [vmem:[%s4123_s17 + $0x3c] sm:$0xff]   ;;  %v3302_v26 = vld [vmem:[%s4123_s17 + $0x54] sm:$0xf] }
  0x93   : > { %v3424_v15 = vcombine.low %v2349_v6, %v2359_v57  ;;  %v1480_v48 = vrot.slane %v1478_v2, 5  ;;  %v2585_v25 = vsel %vm4322_vm7, %v3442_v18, %v2584_v31  ;;  %v2588_v37 = vsel %vm4322_vm7, %v2586_v9, %v2587_v38  ;;  %v3438_v38 = vld [vmem:[%s4123_s17 + $0x48] sm:$0xe] }
  0x94   : > { %v2591_v58 = vrot.slane %v4622_v14, 5  ;;  %v2383_v49 = vsel %vm4167_vm4, %v2378_v4, %v2382_v10  ;;  %v2598_v50 = vrot.slane %v4641_v8, 5  ;;  %v1454_v35 = vshll.u32 %v3296_v56, 16 }
  0x95   : > { %3724 = vmatmul.mubr.msk.bf16.gmra.mrb[4].mxu0 %vm589_vm3, %v3421_v54  ;;  %v1481_v23 = vor.u32 %v1480_v48, %v1477_v42  ;;  %v2373_v54 = vsel %vm4167_vm4, %v2368_v11, %v4811_v22  ;;  %v1460_v14 = vshll.u32 %v4425_v45, 16  ;;  %v3443_v22 = vrot.slane %v3435_v30, 9 }
  0x96   : > { %3727 = vmatprep.mubr.msk.bf16.mxu0 %vm589_vm3, %v3422_v29  ;;  %v1451_v29 = vshrl.u32 %v3296_v56, 16  ;;  %v2594_v8 = vrot.slane %v4664_v41, 5  ;;  %v3451_v59 = vcombine.low %v2585_v25, %v2588_v37  ;;  %v2593_v40 = vrot.slane %v2591_v58, 4  ;;  %v3964_v25 = vld [vmem:[%s4123_s17 + $0x48] sm:$0xff]  }
  0x97   : > { %3642 = vmatmul.mubr.msk.bf16.gmra.mrb[12].mxu1 %vm589_vm3, %v5194_v53  ;;  %v1482_v13 = vrot.slane %v1481_v23, 4  ;;  %v3444_v39 = vrot.slane %v3436_v62, 9  ;;  %v3425_v55 = vcombine.low %v2373_v54, %v2383_v49  ;;  %v2600_v31 = vrot.slane %v2598_v50, 4  ;;  %v3965_v23 = vld [vmem:[%s4123_s17 + $0x54] sm:$0xff]  }
  0x98   : > { %3647 = vmatprep.mubr.msk.bf16.mxu1 %vm589_vm3, %v3959_v24  ;;  %v1464_v24 = vshrl.u32 %v4425_v45, 16  ;;  %v2601_v45 = vrot.slane %v4671_v44, 5  ;;  %v1453_v7 = vrot.slane %v1451_v29, 4  ;;  %v1456_v28 = vrot.slane %v1454_v35, 5 }
  0x99   : > { %v1487_v0 = vsel %vm4167_vm4, %v1482_v13, %v4780_v1  ;;  %v4873_v34 = vrot.slane %v1460_v14, 5  ;;  %v2592_v53 = vsel %vm4322_vm7, %v3443_v22, %v2591_v58  ;;  %v2595_v1 = vsel %vm4322_vm7, %v2593_v40, %v2594_v8  ;;  %v3439_v22 = vld [vmem:[%s4123_s17 + $0x54] sm:$0xe]  ;;  %v5195_v8 = vld [vmem:[#allocation5_spill] sm:$0xff] }
  0x9a   : > { %v1466_v41 = vrot.slane %v1464_v24, 4  ;;  %v2599_v44 = vsel %vm4322_vm7, %v3444_v39, %v2598_v50  ;;  %v2605_v6 = vrot.slane %v4682_v46, 5  ;;  %v1470_v57 = vshll.u32 %v4428_v43, 16  ;;  %v3305_v50 = vld [vmem:[%s4123_s17 + $0x60] sm:$0xf] }
  0x9b   : > { %v2602_v2 = vsel %vm4322_vm7, %v2600_v31, %v2601_v45  ;;  %v1457_v18 = vor.u32 %v1456_v28, %v1453_v7  ;;  %v3452_v46 = vcombine.low %v2592_v53, %v2595_v1  ;;  %v2608_v11 = vrot.slane %v4724_v47, 5  ;;  %v5197_v28 = vld [vmem:[#allocation2_spill] sm:$0xff] }
  0x9c   : > { %v1467_v9 = vor.u32 %v1466_v41, %v4873_v34  ;;  %v1499_v4 = vshrl.u32 %v3302_v26, 16  ;;  %v1502_v10 = vshll.u32 %v3302_v26, 16  ;;  %v1508_v42 = vshll.u32 %v4454_v12, 16 }
  0x9d   : > { %3728 = vmatmul.mubr.msk.bf16.gmra.mrb[8].mxu0 %vm589_vm3, %v3423_v52  ;;  %v3437_v52 = vld [vmem:[%s4123_s17 + $0x3c] sm:$0xe]  ;;  %v2607_v56 = vrot.slane %v2605_v6, 4  ;;  %v1472_v48 = vrot.slane %v1470_v57, 5  ;;  %v2615_v58 = vrot.slane %v4729_v63, 5  ;;  %v2619_v63 = vrot.slane %v4714_v27, 5 }
  0x9e   : > { %3731 = vmatprep.mubr.msk.bf16.mxu0 %vm589_vm3, %v3424_v15  ;;  %v3445_v43 = vrot.slane %v3437_v52, 9  ;;  %v3453_v15 = vcombine.low %v2599_v44, %v2602_v2  ;;  %v1468_v37 = vrot.slane %v1467_v9, 4  ;;  %v1501_v47 = vrot.slane %v1499_v4, 4  ;;  %v3440_v27 = vld [vmem:[%s4123_s17 + $0x60] sm:$0xe] }
  0x9f   : > { %3648 = vmatmul.mubr.msk.bf16.vlgmr.msra.gmra.mrb[0].mxu1 %vm589_vm3, %v3960_v61  ;;  %v1512_v61 = vshrl.u32 %v4454_v12, 16  ;;  %v1504_v54 = vrot.slane %v1502_v10, 5  ;;  %v1510_v49 = vrot.slane %v1508_v42, 5  ;;  %v2609_v29 = vsel %vm4322_vm7, %v2607_v56, %v2608_v11  ;;  %v3966_v52 = vld [vmem:[%s4123_s17 + $0x60] sm:$0xff]  }
  0xa0   : > { %3760 = vmatpush3.bf16.msra.mxu1 %v4102_v3  ;;  %3651 = vmatprep.mubr.msk.bf16.mxu1 %vm589_vm3, %v3961_v51  ;;  %v4870_v3 = vcombine.low %v1487_v0, %v1497_v36  ;;  %v2612_v36 = vrot.slane %v4693_v21, 5  ;;  %v3446_v51 = vrot.slane %v3438_v38, 9  ;;  %v1458_v21 = vrot.slane %v1457_v18, 4  ;;  %v5196_v0 = vld [vmem:[#allocation3_spill] sm:$0xff] }
  0xa1   : > { %v1514_v62 = vrot.slane %v1512_v61, 4  ;;  %v2606_v12 = vsel %vm4322_vm7, %v3445_v43, %v2605_v6  ;;  %v1473_v24 = vsel %vm4167_vm4, %v1468_v37, %v1472_v48  ;;  %v1523_v40 = vshrl.u32 %v3305_v50, 16  ;;  %v3441_v48 = vld [vmem:[%s4123_s17 + $0x6c] sm:$0xe] }
  0xa2   : > { %v2614_v30 = vrot.slane %v2612_v36, 4  ;;  %v2613_v35 = vsel %vm4322_vm7, %v3446_v51, %v2612_v36  ;;  %v1463_v14 = vsel %vm4167_vm4, %v1458_v21, %v4873_v34  ;;  %v1526_v39 = vshll.u32 %v3305_v50, 16 }
  0xa3   : > { %v1536_v31 = vshrl.u32 %v5196_v0, 16  ;;  %v3454_v45 = vcombine.low %v2606_v12, %v2609_v29  ;;  %v1515_v7 = vor.u32 %v1514_v62, %v1510_v49  ;;  %v1518_v34 = vshll.u32 %v5197_v28, 16 }
  0xa4   : > { %v2616_v13 = vsel %vm4322_vm7, %v2614_v30, %v2615_v58  ;;  %v2621_v53 = vrot.slane %v2619_v63, 4  ;;  %v2622_v1 = vrot.slane %v4767_v17, 5  ;;  %v3313_v44 = vcombine.low %v1463_v14, %v1473_v24 }
  0xa5   : > { %3732 = vmatmul.mubr.msk.bf16.gmra.mrb[12].mxu0 %vm589_vm3, %v3425_v55  ;;  %v1532_v55 = vshll.u32 %v5196_v0, 16  ;;  %v3455_v41 = vcombine.low %v2613_v35, %v2616_v13  ;;  %v3448_v6 = vrot.slane %v3440_v27, 9  ;;  %v2629_v26 = vrot.slane %v4788_v33, 5 }
  0xa6   : > { %3737 = vmatprep.mubr.msk.bf16.mxu0 %vm589_vm3, %v3451_v59  ;;  %v2626_v59 = vrot.slane %v5195_v8, 5  ;;  %v1525_v2 = vrot.slane %v1523_v40, 4  ;;  %v1528_v18 = vrot.slane %v1526_v39, 5  ;;  %v1538_v38 = vrot.slane %v1536_v31, 4  ;;  %v4972_v39 = vld [vmem:[%s5171_s3] ss:$0 sm:$0xff] }
  0xa7   : > { %3652 = vmatmul.mubr.msk.bf16.gmra.mrb[4].mxu1 %vm589_vm3, %v3962_v20  ;;  %v1505_v20 = vor.u32 %v1504_v54, %v1501_v47  ;;  %v1534_v9 = vrot.slane %v1532_v55, 5  ;;  %v1520_v43 = vrot.slane %v1518_v34, 5  ;;  %v2623_v33 = vsel %vm4322_vm7, %v2621_v53, %v2622_v1 }
  0xa8   : > { %3655 = vmatprep.mubr.msk.bf16.mxu1 %vm589_vm3, %v3963_v19  ;;  %v3447_v19 = vrot.slane %v3439_v22, 9  ;;  %v2628_v57 = vrot.slane %v2626_v59, 4  ;;  %v2627_v11 = vsel %vm4322_vm7, %v3448_v6, %v2626_v59  ;;  %v2633_v4 = vrot.slane %v4776_v16, 5 }
  0xa9   : > { %v1506_v36 = vrot.slane %v1505_v20, 4  ;;  %v1529_v42 = vor.u32 %v1528_v18, %v1525_v2  ;;  %v1539_v61 = vor.u32 %v1538_v38, %v1534_v9  ;;  %v3449_v30 = vrot.slane %v3441_v48, 9 }
  0xaa   : > { %v2620_v17 = vsel %vm4322_vm7, %v3447_v19, %v2619_v63  ;;  %v2630_v10 = vsel %vm4322_vm7, %v2628_v57, %v2629_v26  ;;  %v2635_v16 = vrot.slane %v2633_v4, 4  ;;  %v2636_v58 = vrot.slane %v4817_v60, 5 }
  0xab   : > { %v1511_v51 = vsel %vm4167_vm4, %v1506_v36, %v1510_v49  ;;  %v3456_v21 = vcombine.low %v2620_v17, %v2623_v33  ;;  %v3457_v37 = vcombine.low %v2627_v11, %v2630_v10  ;;  %v1530_v47 = vrot.slane %v1529_v42, 4 }
  0xac   : > { %v1540_v54 = vrot.slane %v1539_v61, 4  ;;  %v2634_v49 = vsel %vm4322_vm7, %v3449_v30, %v2633_v4  ;;  %v2637_v50 = vsel %vm4322_vm7, %v2635_v16, %v2636_v58 }
  0xad   : > { %3738 = vmatmul.mubr.msk.bf16.vlgmr.msra.gmra.mrb[0].mxu0 %vm589_vm3, %v3452_v46  ;;  %v1516_v46 = vrot.slane %v1515_v7, 4  ;;  %v1535_v60 = vsel %vm4167_vm4, %v1530_v47, %v1534_v9  ;;  %v3458_v29 = vcombine.low %v2634_v49, %v2637_v50 }
  0xae   : > { %3741 = vmatprep.mubr.msk.bf16.mxu0 %vm589_vm3, %v3453_v15  ;;  %v5198_v15 = vld [vmem:[#allocation4_spill] sm:$0xff] }
  0xaf   : > { %3656 = vmatmul.mubr.msk.bf16.gmra.mrb[8].mxu1 %vm589_vm3, %v3964_v25  ;;  %v1542_v56 = vshll.u32 %v5198_v15, 16  ;;  %v1521_v25 = vsel %vm4167_vm4, %v1516_v46, %v1520_v43 }
  0xb0   : > { %3659 = vmatprep.mubr.msk.bf16.mxu1 %vm589_vm3, %v3965_v23  ;;  %v3315_v23 = vcombine.low %v1511_v51, %v1521_v25 }
  0xb1   : > { %v1544_v62 = vrot.slane %v1542_v56, 5 }
  0xb3   : > { %v1545_v12 = vsel %vm4167_vm4, %v1540_v54, %v1544_v62 }
  0xb4   : > { %v3316_v35 = vcombine.low %v1535_v60, %v1545_v12 }
  0xb5   : > { %3742 = vmatmul.mubr.msk.bf16.gmra.mrb[4].mxu0 %vm589_vm3, %v3454_v45 }
  0xb6   : > { %3745 = vmatprep.mubr.msk.bf16.mxu0 %vm589_vm3, %v3455_v41 }
  0xb7   : > { %3660 = vmatmul.mubr.msk.bf16.gmra.mrb[12].mxu1 %vm589_vm3, %v3966_v52 }
  0xb8   : > { %3673 = vmatprep.mubr.msk.bf16.mxu1 %vm589_vm3, %v3313_v44 }
  0xbd   : > { %3746 = vmatmul.mubr.msk.bf16.gmra.mrb[8].mxu0 %vm589_vm3, %v3456_v21 }
  0xbe   : > { %3749 = vmatprep.mubr.msk.bf16.mxu0 %vm589_vm3, %v3457_v37 }
  0xbf   : > { %3674 = vmatmul.mubr.msk.bf16.vlgmr.msra.gmra.mrb[8].mxu1 %vm589_vm3, %v4870_v3 }
  0xc0   : > { %3677 = vmatprep.mubr.msk.bf16.mxu1 %vm589_vm3, %v3315_v23 }
  0xc5   : > { %3750 = vmatmul.mubr.msk.bf16.gmra.mrb[12].mxu0 %vm589_vm3, %v3458_v29 }
  0xc7   : > { %3678 = vmatmul.mubr.msk.bf16.gmra.mrb[12].mxu1 %vm589_vm3, %v3316_v35 }
 0x172   : > { %v3649_v3 = vpop.f32.mrb[0].mxu1 }
 0x173   : > { %v1251_v63 = vpop.f32.mrb[1].mxu1 }
 0x174   : > { %v3650_v14 = vpop.f32.mrb[2].mxu1 }
 0x175   : > { %v1254_v24 = vpop.f32.mrb[3].mxu1 }
 0x17a   : > { %v3653_v5 = vpop.f32.mrb[4].mxu1 }
 0x17b   : > { %v1267_v13 = vpop.f32.mrb[5].mxu1 }
 0x17c   : > { %v3654_v22 = vpop.f32.mrb[6].mxu1 }
 0x17d   : > { %v1270_v8 = vpop.f32.mrb[7].mxu1 }
 0x180   : > { %v3739_v59 = vpop.f32.mrb[0].mxu0 }
 0x181   : > { %v3761_v27 = vadd.f32 %v3739_v59, %v3649_v3  ;;  %v2725_v40 = vpop.f32.mrb[1].mxu0 }
 0x182   : > { %v3762_v0 = vadd.f32 %v2725_v40, %v1251_v63  ;;  %v3740_v55 = vpop.f32.mrb[2].mxu0 }
 0x183   : > { %v2813_v31 = vmul.f32 %v3761_v27, %v4967_v32  ;;  %v3763_v45 = vadd.f32 %v3740_v55, %v3650_v14  ;;  %v2728_v20 = vpop.f32.mrb[3].mxu0 }
 0x184   : > { %v2811_v7 = vmul.f32 %v3762_v0, %v4967_v32  ;;  %v3764_v28 = vadd.f32 %v2728_v20, %v1254_v24 }
 0x185   : > { %v2836_v34 = vadd.f32 %v4972_v39, %v2813_v31  ;;  %v2814_v41 = vmul.f32 %v3763_v45, %v4967_v32 }
 0x186   : > { %v2834_v19 = vadd.f32 %v4972_v39, %v2811_v7  ;;  %v2812_v53 = vmul.f32 %v3764_v28, %v4967_v32 }
 0x187   : > { %v4980_v1 = vmax.f32 %v2836_v34, 0.0  ;;  %v2837_v52 = vadd.f32 %v4972_v39, %v2814_v41 }
 0x188   : > { %v4983_v44 = vmax.f32 %v2834_v19, 0.0  ;;  %v2835_v6 = vadd.f32 %v4972_v39, %v2812_v53  ;;  %v3743_v57 = vpop.f32.mrb[4].mxu0 }
 0x189   : > { %v4986_v26 = vmax.f32 %v2837_v52, 0.0  ;;  %v3765_v2 = vadd.f32 %v3743_v57, %v3653_v5  ;;  %v2741_v18 = vpop.f32.mrb[5].mxu0 }
 0x18a   : > { %v4988_v9 = vmax.f32 %v2835_v6, 0.0  ;;  %v3766_v38 = vadd.f32 %v2741_v18, %v1267_v13  ;;  %v3744_v36 = vpop.f32.mrb[6].mxu0 }
 0x18b   : > { %v2817_v46 = vmul.f32 %v3765_v2, %v4967_v32  ;;  %v3767_v43 = vadd.f32 %v3744_v36, %v3654_v22  ;;  %v2744_v17 = vpop.f32.mrb[7].mxu0 }
 0x18c   : > { %v2815_v33 = vmul.f32 %v3766_v38, %v4967_v32  ;;  %v3768_v11 = vadd.f32 %v2744_v17, %v1270_v8 }
 0x18d   : > { %v2840_v4 = vadd.f32 %v4972_v39, %v2817_v46  ;;  %v2818_v10 = vmul.f32 %v3767_v43, %v4967_v32 }
 0x18e   : > { %v2838_v42 = vadd.f32 %v4972_v39, %v2815_v33  ;;  %v2816_v61 = vmul.f32 %v3768_v11, %v4967_v32 }
 0x18f   : > { %v4996_v15 = vmax.f32 %v2840_v4, 0.0  ;;  %v2841_v56 = vadd.f32 %v4972_v39, %v2818_v10  ;;  %v4012_v4 = vmov (!%p3469_p7), 0.0  }
 0x190   : > { %v4999_v48 = vmax.f32 %v2838_v42, 0.0  ;;  %v2839_v51 = vadd.f32 %v4972_v39, %v2816_v61  ;;  %v3747_v25 = vpop.f32.mrb[8].mxu0  ;;  %2871 = vst.msk [vmem:[%s4121_s14] sm:$0x1] (!%p3469_p7), %vm2870_vm8, %v4012_v4 }
 0x191   : > { %v5002_v21 = vmax.f32 %v2841_v56, 0.0  ;;  %v2757_v30 = vpop.f32.mrb[9].mxu0 }
 0x192   : > { %v3675_v37 = vpop.f32.mrb[8].mxu1  ;;  %v5004_v16 = vmax.f32 %v2839_v51, 0.0  ;;  %v3748_v47 = vpop.f32.mrb[10].mxu0 }
 0x193   : > { %v3769_v58 = vadd.f32 %v3747_v25, %v3675_v37  ;;  %v1665_v23 = vpop.f32.mrb[9].mxu1  ;;  %v2760_v49 = vpop.f32.mrb[11].mxu0 }
 0x194   : > { %v3770_v54 = vadd.f32 %v2757_v30, %v1665_v23  ;;  %v3676_v62 = vpop.f32.mrb[10].mxu1 }
 0x195   : > { %v2821_v50 = vmul.f32 %v3769_v58, %v4967_v32  ;;  %v3771_v60 = vadd.f32 %v3748_v47, %v3676_v62  ;;  %v1668_v12 = vpop.f32.mrb[11].mxu1 }
 0x196   : > { %v2819_v29 = vmul.f32 %v3770_v54, %v4967_v32  ;;  %v3772_v35 = vadd.f32 %v2760_v49, %v1668_v12 }
 0x197   : > { %v2844_v3 = vadd.f32 %v4972_v39, %v2821_v50  ;;  %v2822_v63 = vmul.f32 %v3771_v60, %v4967_v32 }
 0x198   : > { %v2842_v14 = vadd.f32 %v4972_v39, %v2819_v29  ;;  %v2820_v24 = vmul.f32 %v3772_v35, %v4967_v32  ;;  %v3751_v22 = vpop.f32.mrb[12].mxu0 }
 0x199   : > { %v5012_v5 = vmax.f32 %v2844_v3, 0.0  ;;  %v2845_v13 = vadd.f32 %v4972_v39, %v2822_v63  ;;  %v2773_v40 = vpop.f32.mrb[13].mxu0 }
 0x19a   : > { %v5015_v8 = vmax.f32 %v2842_v14, 0.0  ;;  %v2843_v59 = vadd.f32 %v4972_v39, %v2820_v24  ;;  %v3679_v27 = vpop.f32.mrb[12].mxu1  ;;  %v3752_v45 = vpop.f32.mrb[14].mxu0 }
 0x19b   : > { %v5018_v0 = vmax.f32 %v2845_v13, 0.0  ;;  %v3773_v55 = vadd.f32 %v3751_v22, %v3679_v27  ;;  %v1681_v31 = vpop.f32.mrb[13].mxu1  ;;  %v2776_v34 = vpop.f32.mrb[15].mxu0 }
 0x19c   : > { %v5020_v20 = vmax.f32 %v2843_v59, 0.0  ;;  %v3774_v7 = vadd.f32 %v2773_v40, %v1681_v31  ;;  %v3680_v28 = vpop.f32.mrb[14].mxu1 }
 0x19d   : > { %v2825_v41 = vmul.f32 %v3773_v55, %v4967_v32  ;;  %v3775_v19 = vadd.f32 %v3752_v45, %v3680_v28  ;;  %v1684_v53 = vpop.f32.mrb[15].mxu1 }
 0x19e   : > { %v2823_v52 = vmul.f32 %v3774_v7, %v4967_v32  ;;  %v3776_v6 = vadd.f32 %v2776_v34, %v1684_v53  ;;  %2869 = sbr.rel (%p3469_p7) target bundleno = 421 (0x1a5), region = 52 }
 0x19f   : > { %v2848_v57 = vadd.f32 %v4972_v39, %v2825_v41  ;;  %v2826_v2 = vmul.f32 %v3775_v19, %v4967_v32 }
 0x1a0   : > { %v2846_v18 = vadd.f32 %v4972_v39, %v2823_v52  ;;  %v2824_v38 = vmul.f32 %v3776_v6, %v4967_v32 }
 0x1a1   : > { %v5028_v36 = vmax.f32 %v2848_v57, 0.0  ;;  %v2849_v46 = vadd.f32 %v4972_v39, %v2826_v2 }
 0x1a2   : > { %v5031_v43 = vmax.f32 %v2846_v18, 0.0  ;;  %v2847_v17 = vadd.f32 %v4972_v39, %v2824_v38 }
 0x1a3   : > { %v5034_v33 = vmax.f32 %v2849_v46, 0.0 }
 0x1a4   : > { %v5036_v11 = vmax.f32 %v2847_v17, 0.0 }
 0x1a5 PF: > { %vm2873_vm9 = vcmask 64512   ;;  %v2872_v41 = vld [vmem:[%s4121_s14] sm:$0x1]  ;;  %vm2912_vm10 = vcmask 57344   ;;  %p3470_p8 = scmp.ne.s32.totalorder %s3994_s27, 1 }
 0x1a6   : > { %v2874_v32 = vsel %vm2873_vm9, %v4983_v44, 0.0  ;;  %v2875_v10 = vsel %vm2873_vm9, %v4988_v9, 0.0  ;;  %v2877_v39 = vsel %vm2873_vm9, %v4980_v1, 0.0  ;;  %v2879_v61 = vsel %vm2873_vm9, %v4986_v26, 0.0  ;;  %v2920_v52 = vld [vmem:[%s5172_s4] sm:$0xf] (!%p3470_p8) }
 0x1a7   : > { %v2876_v42 = vadd.f32 %v2875_v10, %v2874_v32  ;;  %v2881_v51 = vsel %vm2873_vm9, %v4999_v48, 0.0  ;;  %v2883_v37 = vsel %vm2873_vm9, %v5004_v16, 0.0  ;;  %v2885_v58 = vsel %vm2873_vm9, %v4996_v15, 0.0  ;;  %v2968_v38 = vld [vmem:[%s5173_s5] sm:$0x1] (!%p3470_p8) }
 0x1a8   : > { %v2887_v47 = vsel %vm2873_vm9, %v5002_v21, 0.0  ;;  %v2889_v62 = vsel %vm2873_vm9, %v5015_v8, 0.0  ;;  %v2891_v50 = vsel %vm2873_vm9, %v5020_v20, 0.0  ;;  %v2893_v12 = vsel %vm2873_vm9, %v5012_v5, 0.0  ;;  %v2970_v17 = vld [vmem:[%s5174_s6] sm:$0x1] (!%p3470_p8) }
 0x1a9   : > { %v2878_v56 = vadd.f32 %v2877_v39, %v2876_v42  ;;  %v2895_v35 = vsel %vm2873_vm9, %v5018_v0, 0.0  ;;  %v2897_v63 = vsel %vm2873_vm9, %v5031_v43, 0.0  ;;  %v2899_v24 = vsel %vm2873_vm9, %v5036_v11, 0.0 }
 0x1aa   : > { %v2901_v22 = vsel %vm2873_vm9, %v5028_v36, 0.0  ;;  %v2903_v27 = vsel %vm2873_vm9, %v5034_v33, 0.0  ;;  %vm2924_vm11 = vcmask (!%p3470_p8), 1043456   ;;  %v4013_v6 = vmov (!%p3470_p8), 0.0  }
 0x1ab   : > { %v2880_v25 = vadd.f32 %v2879_v61, %v2878_v56  ;;  %3753 = vmatprep.subr.bf16.mxu0 (!%p3470_p8), %v4013_v6  ;;  %v2926_v57 = vsel (!%p3470_p8), %vm2924_vm11, %v2920_v52, 0  ;;  %vm4014_vm12 = vmmov (!%p3470_p8), 0  }
 0x1ac   : > { %3755 = vmatprep.mubr.msk.bf16.mxu0 (!%p3470_p8), %vm4014_vm12, %v4013_v6  ;;  %3754 = vmatpush3.bf16.msra.mxu0 (!%p3470_p8), %v2926_v57 }
 0x1ad   : > { %v2882_v30 = vadd.f32 %v2881_v51, %v2880_v25 }
 0x1af   : > { %v2884_v23 = vadd.f32 %v2883_v37, %v2882_v30 }
 0x1b1   : > { %v2886_v54 = vadd.f32 %v2885_v58, %v2884_v23 }
 0x1b3   : > { %v2888_v49 = vadd.f32 %v2887_v47, %v2886_v54 }
 0x1b5   : > { %v2890_v60 = vadd.f32 %v2889_v62, %v2888_v49 }
 0x1b7   : > { %v2892_v29 = vadd.f32 %v2891_v50, %v2890_v60 }
 0x1b9   : > { %v2894_v3 = vadd.f32 %v2893_v12, %v2892_v29 }
 0x1bb   : > { %v2896_v14 = vadd.f32 %v2895_v35, %v2894_v3 }
 0x1bd   : > { %v2898_v13 = vadd.f32 %v2897_v63, %v2896_v14 }
 0x1bf   : > { %v2900_v59 = vadd.f32 %v2899_v24, %v2898_v13 }
 0x1c1   : > { %v2902_v40 = vadd.f32 %v2901_v22, %v2900_v59 }
 0x1c3   : > { %v2904_v55 = vadd.f32 %v2903_v27, %v2902_v40 }
 0x1c5   : > { %v2905_v31 = vrot.slane %v2904_v55, 4 }
 0x1c7   : > { %v2906_v45 = vadd.f32 %v2905_v31, %v2904_v55 }
 0x1c9   : > { %v2907_v7 = vrot.slane %v2906_v45, 2 }
 0x1cb   : > { %v2908_v28 = vadd.f32 %v2907_v7, %v2906_v45 }
 0x1cd   : > { %v2909_v34 = vrot.slane %v2908_v28, 1  ;;  %2917 = sbr.rel (%p3470_p8) target bundleno = 720 (0x2d0), region = 56 }
 0x1cf   : > { %v2910_v19 = vadd.f32 %v2909_v34, %v2908_v28 }
 0x1d1   : > { %v2911_v53 = vadd.f32 %v2910_v19, %v2872_v41 }
 0x1d3   : > { %2913 = vst.msk [vmem:[%s4121_s14] sm:$0x1] %vm2912_vm10, %v2911_v53 }
 0x1da   : > { %v2918_v2 = vld [vmem:[%s4121_s14] sm:$0x1] }
 0x1db   : > { %v2919_v18 = vpack.c.bf16 %v2918_v2, %v2918_v2 }
 0x1dd   : > { %3756 = vmatmul.mubr.msk.bf16.vlgmr.msra.gmra.mrb[0].mxu0 %vm2873_vm9, %v2919_v18 }
 0x2b0   : > { %v2962_v46 = vpop.f32.mrb[0].mxu0 }
 0x2b1   : > { %v2969_v4 = vmul.f32 %v2968_v38, %v2962_v46  ;;  %v3757_v32 = vpop.f32.mrb[1].mxu0 }
 0x2b2   : > { %v2965_v10 = vpop.f32.mrb[2].mxu0 }
 0x2b3   : > { %v2971_v39 = vadd.f32 %v2970_v17, %v2969_v4  ;;  %v3758_v42 = vpop.f32.mrb[3].mxu0 }
 0x2b5   : > { %v3472_v61 = vmul.f32 -1.442695, %v2971_v39 }
 0x2b7   : > { %3968 = vpow2.f32 %v3472_v61 }
 0x2c1   : > { %v3969_v56 = vpop.eup %3968 }
 0x2c2   : > { %v2975_v51 = vadd.f32 1.0, %v3969_v56 }
 0x2c4   : > { %3970 = vrcp.f32 %v2975_v51 }
 0x2ce   : > { %v3971_v25 = vpop.eup %3970 }
 0x2cf   : > { %2978 = vst.msk [vmem:[%s4121_s14] sm:$0x1] %vm2912_vm10, %v3971_v25 }
 0x2d0 PF: > { %v3492_v37 = vpack.c.bf16 %v4983_v44, %v4983_v44  ;;  %vm3043_vm13 = vcmask 60416   ;;  %v3493_v30 = vpack.c.bf16 %v4988_v9, %v4988_v9  ;;  %v3494_v58 = vpack.c.bf16 %v4980_v1, %v4980_v1 }
 0x2d1   : > { %v3495_v23 = vpack.c.bf16 %v4986_v26, %v4986_v26  ;;  %v3496_v47 = vpack.c.bf16 %v4999_v48, %v4999_v48  ;;  %v3497_v54 = vpack.c.bf16 %v5004_v16, %v5004_v16  ;;  %v3498_v44 = vpack.c.bf16 %v4996_v15, %v4996_v15 }
 0x2d2   : > { %3044 = vst.msk [vmem:[%s4134_s28] sm:$0xf] %vm3043_vm13, %v3492_v37  ;;  %3045 = vst.msk [vmem:[%s4134_s28 + $0x4] sm:$0xf] %vm3043_vm13, %v3493_v30  ;;  %v3499_v1 = vpack.c.bf16 %v5002_v21, %v5002_v21  ;;  %v3500_v26 = vpack.c.bf16 %v5015_v8, %v5015_v8  ;;  %v3501_v9 = vpack.c.bf16 %v5020_v20, %v5020_v20 }
 0x2d3   : > { %3046 = vst.msk [vmem:[%s4134_s28 + $0x8] sm:$0xf] %vm3043_vm13, %v3494_v58  ;;  %v3502_v15 = vpack.c.bf16 %v5012_v5, %v5012_v5  ;;  %3047 = vst.msk [vmem:[%s4134_s28 + $0xc] sm:$0xf] %vm3043_vm13, %v3495_v23  ;;  %v3503_v48 = vpack.c.bf16 %v5018_v0, %v5018_v0  ;;  %v3504_v21 = vpack.c.bf16 %v5031_v43, %v5031_v43 }
 0x2d4   : > { %3048 = vst.msk [vmem:[%s4134_s28 + $0x10] sm:$0xf] %vm3043_vm13, %v3496_v47  ;;  %3049 = vst.msk [vmem:[%s4134_s28 + $0x14] sm:$0xf] %vm3043_vm13, %v3497_v54  ;;  %v3505_v16 = vpack.c.bf16 %v5036_v11, %v5036_v11  ;;  %v3506_v5 = vpack.c.bf16 %v5028_v36, %v5028_v36  ;;  %v3507_v8 = vpack.c.bf16 %v5034_v33, %v5034_v33 }
 0x2d5   : > { %3050 = vst.msk [vmem:[%s4134_s28 + $0x18] sm:$0xf] %vm3043_vm13, %v3498_v44  ;;  %3051 = vst.msk [vmem:[%s4134_s28 + $0x1c] sm:$0xf] %vm3043_vm13, %v3499_v1 }
 0x2d6   : > { %3052 = vst.msk [vmem:[%s4134_s28 + $0x20] sm:$0xf] %vm3043_vm13, %v3500_v26  ;;  %3053 = vst.msk [vmem:[%s4134_s28 + $0x24] sm:$0xf] %vm3043_vm13, %v3501_v9 }
 0x2d7   : > { %3054 = vst.msk [vmem:[%s4134_s28 + $0x28] sm:$0xf] %vm3043_vm13, %v3502_v15  ;;  %3055 = vst.msk [vmem:[%s4134_s28 + $0x2c] sm:$0xf] %vm3043_vm13, %v3503_v48 }
 0x2d8   : > { %3056 = vst.msk [vmem:[%s4134_s28 + $0x30] sm:$0xf] %vm3043_vm13, %v3504_v21  ;;  %3057 = vst.msk [vmem:[%s4134_s28 + $0x34] sm:$0xf] %vm3043_vm13, %v3505_v16 }
 0x2d9   : > { %3058 = vst.msk [vmem:[%s4134_s28 + $0x38] sm:$0xf] %vm3043_vm13, %v3506_v5  ;;  %3059 = vst.msk [vmem:[%s4134_s28 + $0x3c] sm:$0xf] %vm3043_vm13, %v3507_v8 }
 0x2da PF: > { %s19_s9 = sadd.s32 1, %s4010_s9   ;;  %s5199_s27 = smov %s4002_s29 }
 0x2db   : > { %p16_p9 = scmp.ge.s32.totalorder %s19_s9, 6   ;;  %s5200_s28 = smov %s4006_s30 }
 0x2dc   : > { %s5201_s29 = smov %s5204_s10  ;;  %s5202_s30 = smov %s5208_s11 }
 0x2dd   :  { %18 = sbr.rel (!%p16_p9) target bundleno = 3 (0x3), region = 109 }

</bundles_post_ra>
